<compile_context>
chip_gen: v7x
topology: tpu7x:2x2x1
jax: 0.10.0
libtpu: 0.0.40
codegen_flags: <defaults>
</compile_context>

<pallas_src>
import numpy as np
import jax
import jax.numpy as jnp
from jax.experimental import pallas as pl
from jax.experimental.pallas import tpu as pltpu


# ----------------------------------------------------------------------------
# Fused kernel: sub-pixel transposed conv + (bias+BN folded) scale/shift + ReLU
# ----------------------------------------------------------------------------
def _upsampler_kernel_factory(H, W, Cin, Np):
    K = 4 * Cin

    def kernel(xp_ref, w_ref, s_ref, t_ref, o_ref):
        # 4 shifted views of the (bottom/right zero-padded) input, stacked along
        # the contraction dim.  Shift order: (0,0), (0,1), (1,0), (1,1).
        x00 = xp_ref[0, 0:H, 0:W, :]
        x01 = xp_ref[0, 0:H, 1:W + 1, :]
        x10 = xp_ref[0, 1:H + 1, 0:W, :]
        x11 = xp_ref[0, 1:H + 1, 1:W + 1, :]
        patch = jnp.concatenate([x00, x01, x10, x11], axis=-1)      # (H, W, 4*Cin)
        patch = patch.reshape(H * W, K)

        # One big MXU contraction: all taps (K) and all 4 output phases (N).
        acc = jnp.dot(patch, w_ref[...],                            # (H*W, 4*Cpad) f32
                      preferred_element_type=jnp.float32)
        y = acc * s_ref[...] + t_ref[...]                           # BN + folded bias
        y = jnp.maximum(y, 0.0)                                     # ReLU
        o_ref[0] = y.reshape(H, W, Np)                              # lane-dense store

    return kernel


def upsampler_block_pallas(x, w_comb, scale4, shift4, cout, cpad):
    """x: (N, H, W, Cin) f32.  Returns (N, 2H, 2W, cout) f32."""
    N, H, W, Cin = x.shape
    Np = 4 * cpad
    # One-pixel bottom/right zero pad supplies the halo for all 4 sub-pixel shifts.
    xp = jnp.pad(x, ((0, 0), (0, 1), (0, 1), (0, 0))).astype(jnp.bfloat16)

    yk = pl.pallas_call(
        _upsampler_kernel_factory(H, W, Cin, Np),
        out_shape=jax.ShapeDtypeStruct((N, H, W, Np), jnp.float32),
        grid=(N,),
        in_specs=[
            pl.BlockSpec((1, H + 1, W + 1, Cin), lambda n: (n, 0, 0, 0)),
            pl.BlockSpec((4 * Cin, Np), lambda n: (0, 0)),
            pl.BlockSpec((1, Np), lambda n: (0, 0)),
            pl.BlockSpec((1, Np), lambda n: (0, 0)),
        ],
        out_specs=pl.BlockSpec((1, H, W, Np), lambda n: (n, 0, 0, 0)),
        compiler_params=pltpu.CompilerParams(dimension_semantics=("parallel",)),
    )(xp, w_comb.astype(jnp.bfloat16), scale4, shift4)

    # Depth-to-space (2x2 pixel shuffle) + drop channel padding: layout plumbing only.
    y = yk.reshape(N, H, W, 2, 2, cpad).transpose(0, 1, 3, 2, 4, 5)
    return y.reshape(N, 2 * H, 2 * W, cpad)[..., :cout]


# ----------------------------------------------------------------------------
# Host-side parameter folding
# ----------------------------------------------------------------------------
def convT_to_flipped_hwio(w_pt):
    # PyTorch ConvTranspose2d weight (Cin, Cout, KH, KW) -> flipped HWIO so that
    # convT(x, W) == conv(zero_insert_pad(x), wf).
    return jnp.transpose(w_pt, (2, 3, 0, 1))[::-1, ::-1]


def build_subpixel_weight(wf, cpad):
    """(3,3,Cin,Cout) flipped-HWIO weight -> (4*Cin, 4*Cpad) sub-pixel matrix.

    Row = shift*Cin + ci  with shifts (dy,dx) in (0,0),(0,1),(1,0),(1,1)
    Col = phase*Cpad + co with phase = ph*2 + pw (output row/col parity)
    Derivation (per axis, s=2, p=1, op=1): even outputs use tap wf[1];
    odd outputs use wf[0] at offset 0 and wf[2] at offset +1 (zero past the edge).
    """
    KH, KW, Cin, Cout = wf.shape
    assert (KH, KW) == (3, 3)
    wfn = np.asarray(wf, np.float32)
    wc = np.zeros((4, Cin, 4, cpad), np.float32)
    taps = {
        (0, 0): [(0, (1, 1))],
        (0, 1): [(0, (1, 0)), (1, (1, 2))],
        (1, 0): [(0, (0, 1)), (2, (2, 1))],
        (1, 1): [(0, (0, 0)), (1, (0, 2)), (2, (2, 0)), (3, (2, 2))],
    }
    for (ph, pw), lst in taps.items():
        p = ph * 2 + pw
        for s, (kh, kw) in lst:
            wc[s, :, p, :Cout] = wfn[kh, kw]
    return jnp.asarray(wc.reshape(4 * Cin, 4 * cpad))


def fold_bias_bn(bias, gamma, beta, mean, var, eps, cpad):
    # bn(conv + bias) = conv*scale + ((bias - mean)*scale + beta)
    scale = gamma / jnp.sqrt(var + eps)
    shift = (bias - mean) * scale + beta
    cout = scale.shape[0]
    scale_p = jnp.zeros((cpad,), jnp.float32).at[:cout].set(scale)
    shift_p = jnp.zeros((cpad,), jnp.float32).at[:cout].set(shift)
    scale4 = jnp.tile(scale_p, 4).reshape(1, 4 * cpad)
    shift4 = jnp.tile(shift_p, 4).reshape(1, 4 * cpad)
    return scale4, shift4, scale, shift


# ----------------------------------------------------------------------------
# Pure-JAX reference (zero-insertion transposed conv) for self-validation
# ----------------------------------------------------------------------------
def upsampler_block_ref(x, wf, scale, shift):
    N, H, W, C = x.shape
    up = jnp.zeros((N, 2 * H - 1, 2 * W - 1, C), x.dtype)
    up = up.at[:, ::2, ::2, :].set(x)
    up = jnp.pad(up, ((0, 0), (1, 2), (1, 2), (0, 0)))     # k-1-p = 1, +out_pad = 2
    y = jax.lax.conv_general_dilated(
        up, wf, (1, 1), "VALID",
        dimension_numbers=("NHWC", "HWIO", "NHWC"),
        precision=jax.lax.Precision.HIGHEST)
    return jnp.maximum(y * scale + shift, 0.0)


# ----------------------------------------------------------------------------
if __name__ == "__main__":
    N, H, W = 2, 16, 16
    Cin, Cout = 128, 64            # UpsamplerBlock(128, 64): ERFNet decoder sizes
    eps = 1e-3

    key = jax.random.PRNGKey(0)
    ks = jax.random.split(key, 7)
    x = jax.random.normal(ks[0], (N, H, W, Cin), jnp.float32)   # NHWC

    # Deterministic PyTorch-layout parameters.
    w_pt = jax.random.normal(ks[1], (Cin, Cout, 3, 3), jnp.float32) / np.sqrt(Cin * 9)
    bias = jax.random.normal(ks[2], (Cout,), jnp.float32) * 0.1
    gamma = 0.5 + jax.random.uniform(ks[3], (Cout,), jnp.float32)
    beta = jax.random.normal(ks[4], (Cout,), jnp.float32) * 0.1
    mean = jax.random.normal(ks[5], (Cout,), jnp.float32) * 0.1
    var = 0.5 + jax.random.uniform(ks[6], (Cout,), jnp.float32)

    cpad = ((Cout + 31) // 32) * 32        # keep 4*Cpad a multiple of 128 (lane-dense)
    wf = convT_to_flipped_hwio(w_pt)
    w_comb = build_subpixel_weight(wf, cpad)
    scale4, shift4, scale, shift = fold_bias_bn(bias, gamma, beta, mean, var, eps, cpad)

    out = upsampler_block_pallas(x, w_comb, scale4, shift4, Cout, cpad)
    out = jax.block_until_ready(out)
    assert out.shape == (N, 2 * H, 2 * W, Cout), out.shape

    # Reference uses the same bf16-rounded dot operands (the kernel's intended
    # numerics), so only accumulation order / conv algorithm differ.
    x_q = x.astype(jnp.bfloat16).astype(jnp.float32)
    wf_q = wf.astype(jnp.bfloat16).astype(jnp.float32)
    ref = jax.block_until_ready(upsampler_block_ref(x_q, wf_q, scale, shift))
    np.testing.assert_allclose(np.asarray(out), np.asarray(ref), rtol=1e-2, atol=1e-2)

    print("KERNEL_OK")
</pallas_src>

<mosaic_0001>
module attributes {stable_mosaic.version = 11 : i64} {
  func.func @kernel(%arg0: i32, %arg1: memref<1x17x17x128xbf16, #tpu.memory_space<vmem>>, %arg2: memref<512x256xbf16, #tpu.memory_space<vmem>>, %arg3: memref<1x256xf32, #tpu.memory_space<vmem>>, %arg4: memref<1x256xf32, #tpu.memory_space<vmem>>, %arg5: memref<1x16x16x256xf32, #tpu.memory_space<vmem>>) attributes {dimension_semantics = [#tpu.dimension_semantics<parallel>], iteration_bounds = array<i64: 2>, scalar_prefetch = 0 : i64, scratch_operands = 0 : i64, tpu.core_type = #tpu.core_type<tc>, window_params = [{transform_indices = @transform_0, window_bounds = array<i64: 1, 17, 17, 128>}, {pipeline_mode = #tpu.pipeline_mode<synchronous>, transform_indices = @transform_1, window_bounds = array<i64: 512, 256>}, {pipeline_mode = #tpu.pipeline_mode<synchronous>, transform_indices = @transform_2, window_bounds = array<i64: 1, 256>}, {pipeline_mode = #tpu.pipeline_mode<synchronous>, transform_indices = @transform_3, window_bounds = array<i64: 1, 256>}, {transform_indices = @transform_4, window_bounds = array<i64: 1, 16, 16, 256>}]} {
    %c0 = arith.constant 0 : index
    %c0_0 = arith.constant 0 : index
    %c0_1 = arith.constant 0 : index
    %c0_2 = arith.constant 0 : index
    %0 = vector.load %arg1[%c0, %c0_0, %c0_1, %c0_2] : memref<1x17x17x128xbf16, #tpu.memory_space<vmem>>, vector<1x16x16x128xbf16>
    %1 = vector.shape_cast %0 : vector<1x16x16x128xbf16> to vector<16x16x128xbf16>
    %c0_3 = arith.constant 0 : index
    %c0_4 = arith.constant 0 : index
    %c1 = arith.constant 1 : index
    %c0_5 = arith.constant 0 : index
    %2 = vector.load %arg1[%c0_3, %c0_4, %c1, %c0_5] : memref<1x17x17x128xbf16, #tpu.memory_space<vmem>>, vector<1x16x16x128xbf16>
    %3 = vector.shape_cast %2 : vector<1x16x16x128xbf16> to vector<16x16x128xbf16>
    %c0_6 = arith.constant 0 : index
    %c1_7 = arith.constant 1 : index
    %c0_8 = arith.constant 0 : index
    %c0_9 = arith.constant 0 : index
    %4 = vector.load %arg1[%c0_6, %c1_7, %c0_8, %c0_9] : memref<1x17x17x128xbf16, #tpu.memory_space<vmem>>, vector<1x16x16x128xbf16>
    %5 = vector.shape_cast %4 : vector<1x16x16x128xbf16> to vector<16x16x128xbf16>
    %c0_10 = arith.constant 0 : index
    %c1_11 = arith.constant 1 : index
    %c1_12 = arith.constant 1 : index
    %c0_13 = arith.constant 0 : index
    %6 = vector.load %arg1[%c0_10, %c1_11, %c1_12, %c0_13] : memref<1x17x17x128xbf16, #tpu.memory_space<vmem>>, vector<1x16x16x128xbf16>
    %7 = vector.shape_cast %6 : vector<1x16x16x128xbf16> to vector<16x16x128xbf16>
    %8 = tpu.concatenate %1, %3, %5, %7 in 2 : vector<16x16x128xbf16>, vector<16x16x128xbf16>, vector<16x16x128xbf16>, vector<16x16x128xbf16> -> vector<16x16x512xbf16>
    %9 = vector.shape_cast %8 : vector<16x16x512xbf16> to vector<256x512xbf16>
    %c0_14 = arith.constant 0 : index
    %c0_15 = arith.constant 0 : index
    %10 = vector.load %arg2[%c0_14, %c0_15] : memref<512x256xbf16, #tpu.memory_space<vmem>>, vector<512x256xbf16>
    %cst = arith.constant dense<0.000000e+00> : vector<256x256xf32>
    %11 = tpu.matmul %9, %10, %cst {dimension_numbers = #tpu.dot_dimension_numbers<[1], [0], [0], [1], [0, 0, 1, 1], [], []>} : vector<256x512xbf16>, vector<512x256xbf16>, vector<256x256xf32> -> vector<256x256xf32>
    %c0_16 = arith.constant 0 : index
    %c0_17 = arith.constant 0 : index
    %12 = vector.load %arg3[%c0_16, %c0_17] : memref<1x256xf32, #tpu.memory_space<vmem>>, vector<1x256xf32>
    %13 = vector.broadcast %12 : vector<1x256xf32> to vector<256x256xf32>
    %14 = arith.mulf %11, %13 : vector<256x256xf32>
    %c0_18 = arith.constant 0 : index
    %c0_19 = arith.constant 0 : index
    %15 = vector.load %arg4[%c0_18, %c0_19] : memref<1x256xf32, #tpu.memory_space<vmem>>, vector<1x256xf32>
    %16 = vector.broadcast %15 : vector<1x256xf32> to vector<256x256xf32>
    %17 = arith.addf %14, %16 : vector<256x256xf32>
    %cst_20 = arith.constant 0.000000e+00 : f32
    %18 = vector.broadcast %cst_20 : f32 to vector<256x256xf32>
    %19 = arith.maximumf %17, %18 : vector<256x256xf32>
    %20 = vector.shape_cast %19 : vector<256x256xf32> to vector<16x16x256xf32>
    %c0_21 = arith.constant 0 : index
    %c0_22 = arith.constant 0 : index
    %c0_23 = arith.constant 0 : index
    %c0_24 = arith.constant 0 : index
    %21 = vector.load %arg5[%c0_21, %c0_22, %c0_23, %c0_24] : memref<1x16x16x256xf32, #tpu.memory_space<vmem>>, vector<1x16x16x256xf32>
    %22 = vector.shape_cast %21 : vector<1x16x16x256xf32> to vector<16x16x256xf32>
    %23 = vector.shape_cast %20 : vector<16x16x256xf32> to vector<1x16x16x256xf32>
    tpu.vector_store %arg5[%c0_21, %c0_22, %c0_23, %c0_24], %23 {strides = array<i32>} : memref<1x16x16x256xf32, #tpu.memory_space<vmem>>, vector<1x16x16x256xf32>,
    return
  }
  func.func @transform_0(%arg0: i32) -> (i32, i32, i32, i32) {
    %c0_i32 = arith.constant 0 : i32
    %c0_i32_0 = arith.constant 0 : i32
    %c0_i32_1 = arith.constant 0 : i32
    %c0_i32_2 = arith.constant 0 : i32
    return %arg0, %c0_i32, %c0_i32_0, %c0_i32_1 : i32, i32, i32, i32
  }
  func.func @transform_1(%arg0: i32) -> (i32, i32) {
    %c0_i32 = arith.constant 0 : i32
    %c0_i32_0 = arith.constant 0 : i32
    %c0_i32_1 = arith.constant 0 : i32
    return %c0_i32, %c0_i32_0 : i32, i32
  }
  func.func @transform_2(%arg0: i32) -> (i32, i32) {
    %c0_i32 = arith.constant 0 : i32
    %c0_i32_0 = arith.constant 0 : i32
    %c0_i32_1 = arith.constant 0 : i32
    return %c0_i32, %c0_i32_0 : i32, i32
  }
  func.func @transform_3(%arg0: i32) -> (i32, i32) {
    %c0_i32 = arith.constant 0 : i32
    %c0_i32_0 = arith.constant 0 : i32
    %c0_i32_1 = arith.constant 0 : i32
    return %c0_i32, %c0_i32_0 : i32, i32
  }
  func.func @transform_4(%arg0: i32) -> (i32, i32, i32, i32) {
    %c0_i32 = arith.constant 0 : i32
    %c0_i32_0 = arith.constant 0 : i32
    %c0_i32_1 = arith.constant 0 : i32
    %c0_i32_2 = arith.constant 0 : i32
    return %arg0, %c0_i32, %c0_i32_0, %c0_i32_1 : i32, i32, i32, i32
  }
}

</mosaic_0001>

<bundles_post_ra>
// kernel: tpu_custom_call.1
= control target key start
LH: loop header
LB: loop body
LE: loop exit
PB: predicated region body
PF: predicated region fallthrough
CT: control target
= control target key end

     0   :  { %9 = vsyncpa [#allocation3], 0  ;;  %s3416_s0 = inlined_call_operand.vmem [shape: bf16[2,17,17,128], index: 0, kind: input, shape index: {}]   ;;  %s3417_s1 = inlined_call_operand.vmem [shape: bf16[512,256], index: 1, kind: input, shape index: {}]   ;;  %s3418_s2 = inlined_call_operand.vmem [shape: f32[1,256], index: 2, kind: input, shape index: {}]   ;;  %s3419_s3 = inlined_call_operand.vmem [shape: f32[1,256], index: 3, kind: input, shape index: {}]   ;;  %s3420_s4 = inlined_call_operand.hbm [shape: f32[2,16,16,256], index: 4, kind: output, shape index: {}]  }
   0x1   :  { %11 = vsyncpa [#allocation3 + $0x1], 0  ;;  %s2670_s15 = smov 0   ;;  %s2672_s16 = smov 0  }
   0x2   :  { %s2674_s17 = smov 0   ;;  %s2676_s18 = smov 0  }
   0x3 LB: > { %s2691_s19 = sadd.s32 4294967295, %s2640_s18   ;;  %s2124_s20 = sadd.s32 4294967294, %s2640_s18   ;;  %s2640_s18 = sphi %s2676_s18, %s3426_s18   ;;  %s2636_s17 = sphi %s2674_s17, %s3425_s17   ;;  %s2632_s16 = sphi %s2672_s16, %s3424_s16   ;;  %s2628_s15 = sphi %s2670_s15, %s3423_s15  }
   0x4   : > { %s2695_s21 = sadd.s32 1, %s2640_s18   ;;  %s113_s22 = sadd.s32 1, %s2636_s17 }
   0x5   : > { %s110_s23 = ssub.s32 %s2640_s18, %s2695_s21  ;;  %p123_p0 = scmp.ne.s32.totalorder %s2636_s17, %s2632_s16 }
   0x6   : > { %p111_p1 = scmp.eq.s32.totalorder %s110_s23, 0  ;;  %p124_p2 = scmp.eq.s32.totalorder %s2691_s19, 1 }
   0x7   : > { %p129_p3 = scmp.ne.s32.totalorder %s2632_s16, %s2628_s15  ;;  %p130_p4 = scmp.eq.s32.totalorder %s2124_s20, 1 }
   0x8   : > { %s2706_s24 = scalar_select %p111_p1, %s2636_s17, %s113_s22  }
   0x9   : > { %p2708_p5 = por %p124_p2, %p123_p0  ;;  %p2712_p6 = por %p130_p4, %p129_p3 }
   0xa   : > { %p2127_p7 = scmp.ge.s32.totalorder %s2640_s18, 1  ;;  %p165_p8 = scmp.lt.s32.totalorder %s2640_s18, 3 }
   0xc   : > { %p166_p9 = pnand %p2127_p7, %p165_p8 }
   0xd   : > { %v2418_v0 = vld [vmem:[%s3417_s1 + $0x4] ss:$8 sps:$4 sm:$0xff] (!%p166_p9)   ;;  %v2422_v2 = vld [vmem:[%s3417_s1] ss:$8 sps:$4 sm:$0xff] (!%p166_p9)   ;;  %v2424_v4 = vld [vmem:[%s3417_s1 + $0x14] ss:$8 sps:$4 sm:$0xff] (!%p166_p9)  }
   0xe   : > { %169 = sbr.rel (%p166_p9) target bundleno = 437 (0x1b5), region = 36  ;;  %v2420_v1 = vld [vmem:[%s3417_s1 + $0x104] ss:$8 sps:$4 sm:$0xff] (!%p166_p9)   ;;  %1382 = vmatprep.subr.bf16.mxu1 (!%p166_p9), %v2418_v0  ;;  %v2423_v3 = vld [vmem:[%s3417_s1 + $0x100] ss:$8 sps:$4 sm:$0xff] (!%p166_p9)   ;;  %p191_p10 = scmp.lt.s32.totalorder (!%p166_p9), %s2691_s19, 1 }
   0xf   : > { %1575 = vmatprep.subr.bf16.mxu0 (!%p166_p9), %v2420_v1  ;;  %1383 = vmatpush1.bf16.msra.mxu1 (!%p166_p9), %v2422_v2  ;;  %v2426_v5 = vld [vmem:[%s3417_s1 + $0x114] ss:$8 sps:$4 sm:$0xff] (!%p166_p9)   ;;  %v2428_v6 = vld [vmem:[%s3417_s1 + $0x10] ss:$8 sps:$4 sm:$0xff] (!%p166_p9)   ;;  %v2430_v8 = vld [vmem:[%s3417_s1 + $0x24] ss:$8 sps:$4 sm:$0xff] (!%p166_p9)  }
  0x10   : > { %1576 = vmatpush1.bf16.msra.mxu0 (!%p166_p9), %v2423_v3  ;;  %1384 = vmatprep.subr.bf16.mxu1 (!%p166_p9), %v2424_v4  ;;  %v2429_v7 = vld [vmem:[%s3417_s1 + $0x110] ss:$8 sps:$4 sm:$0xff] (!%p166_p9)   ;;  %v2432_v9 = vld [vmem:[%s3417_s1 + $0x124] ss:$8 sps:$4 sm:$0xff] (!%p166_p9)   ;;  %v2434_v10 = vld [vmem:[%s3417_s1 + $0x20] ss:$8 sps:$4 sm:$0xff] (!%p166_p9)  }
  0x11   : > { %1577 = vmatprep.subr.bf16.mxu0 (!%p166_p9), %v2426_v5  ;;  %v2435_v11 = vld [vmem:[%s3417_s1 + $0x120] ss:$8 sps:$4 sm:$0xff] (!%p166_p9)   ;;  %v2436_v12 = vld [vmem:[%s3417_s1 + $0x34] ss:$8 sps:$4 sm:$0xff] (!%p166_p9)   ;;  %v2440_v14 = vld [vmem:[%s3417_s1 + $0x30] ss:$8 sps:$4 sm:$0xff] (!%p166_p9)  }
  0x12   : > { %v2438_v13 = vld [vmem:[%s3417_s1 + $0x134] ss:$8 sps:$4 sm:$0xff] (!%p166_p9)   ;;  %v2441_v15 = vld [vmem:[%s3417_s1 + $0x130] ss:$8 sps:$4 sm:$0xff] (!%p166_p9)   ;;  %v2442_v16 = vld [vmem:[%s3417_s1 + $0x44] ss:$8 sps:$4 sm:$0xff] (!%p166_p9)  }
  0x13   : > { %1385 = vmatpush1.bf16.msra.mxu1 (!%p166_p9), %v2428_v6  ;;  %v2444_v17 = vld [vmem:[%s3417_s1 + $0x144] ss:$8 sps:$4 sm:$0xff] (!%p166_p9)   ;;  %v2446_v18 = vld [vmem:[%s3417_s1 + $0x40] ss:$8 sps:$4 sm:$0xff] (!%p166_p9)   ;;  %v2448_v20 = vld [vmem:[%s3417_s1 + $0x54] ss:$8 sps:$4 sm:$0xff] (!%p166_p9)  }
  0x14   : > { %1578 = vmatpush1.bf16.msra.mxu0 (!%p166_p9), %v2429_v7  ;;  %1386 = vmatprep.subr.bf16.mxu1 (!%p166_p9), %v2430_v8  ;;  %v2447_v19 = vld [vmem:[%s3417_s1 + $0x140] ss:$8 sps:$4 sm:$0xff] (!%p166_p9)   ;;  %v2450_v21 = vld [vmem:[%s3417_s1 + $0x154] ss:$8 sps:$4 sm:$0xff] (!%p166_p9)   ;;  %v2452_v22 = vld [vmem:[%s3417_s1 + $0x50] ss:$8 sps:$4 sm:$0xff] (!%p166_p9)  }
  0x15   : > { %1579 = vmatprep.subr.bf16.mxu0 %v2432_v9  ;;  %v2453_v23 = vld [vmem:[%s3417_s1 + $0x150] ss:$8 sps:$4 sm:$0xff]   ;;  %v2454_v24 = vld [vmem:[%s3417_s1 + $0x64] ss:$8 sps:$4 sm:$0xff]   ;;  %v2458_v26 = vld [vmem:[%s3417_s1 + $0x60] ss:$8 sps:$4 sm:$0xff]  }
  0x16   : > { %v2456_v25 = vld [vmem:[%s3417_s1 + $0x164] ss:$8 sps:$4 sm:$0xff]   ;;  %v2459_v27 = vld [vmem:[%s3417_s1 + $0x160] ss:$8 sps:$4 sm:$0xff]   ;;  %v2460_v28 = vld [vmem:[%s3417_s1 + $0x74] ss:$8 sps:$4 sm:$0xff]  }
  0x17   : > { %1387 = vmatpush1.bf16.msra.mxu1 %v2434_v10  ;;  %v2462_v29 = vld [vmem:[%s3417_s1 + $0x174] ss:$8 sps:$4 sm:$0xff]   ;;  %v2464_v30 = vld [vmem:[%s3417_s1 + $0x70] ss:$8 sps:$4 sm:$0xff]   ;;  %v2466_v32 = vld [vmem:[%s3417_s1 + $0x84] ss:$8 sps:$4 sm:$0xff]  }
  0x18   : > { %1580 = vmatpush1.bf16.msra.mxu0 %v2435_v11  ;;  %1388 = vmatprep.subr.bf16.mxu1 %v2436_v12  ;;  %v2465_v31 = vld [vmem:[%s3417_s1 + $0x170] ss:$8 sps:$4 sm:$0xff]   ;;  %v2468_v33 = vld [vmem:[%s3417_s1 + $0x184] ss:$8 sps:$4 sm:$0xff]   ;;  %v2470_v34 = vld [vmem:[%s3417_s1 + $0x80] ss:$8 sps:$4 sm:$0xff]  }
  0x19   : > { %1581 = vmatprep.subr.bf16.mxu0 %v2438_v13  ;;  %v2471_v35 = vld [vmem:[%s3417_s1 + $0x180] ss:$8 sps:$4 sm:$0xff]   ;;  %v2472_v36 = vld [vmem:[%s3417_s1 + $0x94] ss:$8 sps:$4 sm:$0xff]   ;;  %s192_s7 = scalar_select %p191_p10, %s2691_s19, 1 }
  0x1a   : > { %v2474_v37 = vld [vmem:[%s3417_s1 + $0x194] ss:$8 sps:$4 sm:$0xff]   ;;  %v2476_v38 = vld [vmem:[%s3417_s1 + $0x90] ss:$8 sps:$4 sm:$0xff]   ;;  %v2478_v40 = vld [vmem:[%s3417_s1 + $0xa4] ss:$8 sps:$4 sm:$0xff]  }
  0x1b   : > { %1389 = vmatpush1.bf16.msra.mxu1 %v2440_v14  ;;  %v2477_v39 = vld [vmem:[%s3417_s1 + $0x190] ss:$8 sps:$4 sm:$0xff]   ;;  %s2376_s22 = smul.u32 204, %s192_s7  ;;  %v2480_v41 = vld [vmem:[%s3417_s1 + $0x1a4] ss:$8 sps:$4 sm:$0xff]   ;;  %s188_s29 = sand.u32 1, %s2632_s16  }
  0x1c   : > { %1582 = vmatpush1.bf16.msra.mxu0 %v2441_v15  ;;  %1390 = vmatprep.subr.bf16.mxu1 %v2442_v16  ;;  %v2482_v42 = vld [vmem:[%s3417_s1 + $0xa0] ss:$8 sps:$4 sm:$0xff]   ;;  %v2484_v44 = vld [vmem:[%s3417_s1 + $0xb4] ss:$8 sps:$4 sm:$0xff]   ;;  %vm437_vm0 = vsmask.f32 7424 }
  0x1d   : > { %1583 = vmatprep.subr.bf16.mxu0 %v2444_v17  ;;  %v2483_v43 = vld [vmem:[%s3417_s1 + $0x1a0] ss:$8 sps:$4 sm:$0xff]   ;;  %s2858_s10 = scalar_lea.vmem %s3416_s0, %s2376_s22  ;;  %v2486_v45 = vld [vmem:[%s3417_s1 + $0x1b4] ss:$8 sps:$4 sm:$0xff]   ;;  %v2488_v46 = vld [vmem:[%s3417_s1 + $0xb0] ss:$8 sps:$4 sm:$0xff]  }
  0x1e   : > { %v2489_v47 = vld [vmem:[%s3417_s1 + $0x1b0] ss:$8 sps:$4 sm:$0xff]   ;;  %v2490_v48 = vld [vmem:[%s3417_s1 + $0xc4] ss:$8 sps:$4 sm:$0xff]   ;;  %v2494_v55 = vld [vmem:[%s3417_s1 + $0xc0] ss:$8 sps:$4 sm:$0xff]  }
  0x1f   : > { %1391 = vmatpush1.bf16.msra.mxu1 %v2446_v18  ;;  %v2492_v49 = vld [vmem:[%s3417_s1 + $0x1c4] ss:$8 sps:$4 sm:$0xff]   ;;  %v2515_v51 = vld [vmem:[%s2858_s10 + $0x8] ss:$0 sps:$4 sm:$0x11]   ;;  %v2903_v5 = vld [vmem:[%s2858_s10 + $0x18] sm:$0xff]  }
  0x20   : > { %1584 = vmatpush1.bf16.msra.mxu0 %v2447_v19  ;;  %1392 = vmatprep.subr.bf16.mxu1 %v2448_v20  ;;  %v2876_v50 = vld [vmem:[%s2858_s10] sm:$0xff]   ;;  %v2880_v52 = vld [vmem:[%s2858_s10 + $0xc] sm:$0xff]   ;;  %v446_v57 = vshll.u32 %v2515_v51, 16  ;;  %v2517_v58 = vld [vmem:[%s2858_s10 + $0x14] ss:$0 sps:$4 sm:$0x11]  }
  0x21   : > { %1585 = vmatprep.subr.bf16.mxu0 %v2450_v21  ;;  %v439_v53 = vshrl.u32 %v2876_v50, 16  ;;  %v441_v54 = vshll.u32 %v2876_v50, 16  ;;  %v2495_v56 = vld [vmem:[%s3417_s1 + $0x1c0] ss:$8 sps:$4 sm:$0xff]   ;;  %v791_v59 = vshrl.u32 %v2880_v52, 16  ;;  %v793_v60 = vshll.u32 %v2880_v52, 16 }
  0x22   : > { %v448_v62 = vrot.slane %v446_v57, 1  ;;  %v798_v0 = vshll.u32 %v2517_v58, 16  ;;  %v2894_v1 = vld [vmem:[%s2858_s10 + $0xc] sm:$0xff]   ;;  %v2496_v2 = vld [vmem:[%s3417_s1 + $0xd4] ss:$8 sps:$4 sm:$0xff]   ;;  %v805_v17 = vshll.u32 %v2903_v5, 16 }
  0x23   : > { %1393 = vmatpush1.bf16.msra.mxu1 %v2452_v22  ;;  %v443_v61 = vrot.slane %v441_v54, 1  ;;  %v795_v63 = vrot.slane %v793_v60, 1  ;;  %v2498_v3 = vld [vmem:[%s3417_s1 + $0x1d4] ss:$8 sps:$4 sm:$0xff]   ;;  %v2500_v6 = vld [vmem:[%s3417_s1 + $0xd0] ss:$8 sps:$4 sm:$0xff]  }
  0x24   : > { %1586 = vmatpush1.bf16.msra.mxu0 %v2453_v23  ;;  %1394 = vmatprep.subr.bf16.mxu1 %v2454_v24  ;;  %v2501_v7 = vld [vmem:[%s3417_s1 + $0x1d0] ss:$8 sps:$4 sm:$0xff]   ;;  %v800_v9 = vrot.slane %v798_v0, 1  ;;  %v2502_v10 = vld [vmem:[%s3417_s1 + $0xe4] ss:$8 sps:$4 sm:$0xff]   ;;  %v453_v15 = vshll.u32 %v2894_v1, 16 }
  0x25   : > { %1587 = vmatprep.subr.bf16.mxu0 %v2456_v25  ;;  %v444_v4 = vor.u32 %v443_v61, %v439_v53  ;;  %v796_v8 = vor.u32 %v795_v63, %v791_v59  ;;  %v2504_v11 = vld [vmem:[%s3417_s1 + $0x1e4] ss:$8 sps:$4 sm:$0xff]   ;;  %v2519_v13 = vld [vmem:[%s2858_s10 + $0x14] ss:$0 sps:$4 sm:$0x11]   ;;  %v451_v22 = vshrl.u32 %v2894_v1, 16 }
  0x26   : > { %v2521_v16 = vld [vmem:[%s2858_s10 + $0x20] ss:$0 sps:$4 sm:$0x11]   ;;  %v2508_v20 = vld [vmem:[%s3417_s1 + $0xf4] ss:$8 sps:$4 sm:$0xff]   ;;  %v455_v23 = vrot.slane %v453_v15, 1 }
  0x27   : > { %1395 = vmatpush1.bf16.msra.mxu1 %v2458_v26  ;;  %v449_v12 = vsel %vm437_vm0, %v444_v4, %v448_v62  ;;  %v801_v14 = vsel %vm437_vm0, %v796_v8, %v800_v9  ;;  %v2506_v18 = vld [vmem:[%s3417_s1 + $0xe0] ss:$8 sps:$4 sm:$0xff]   ;;  %v2510_v21 = vld [vmem:[%s3417_s1 + $0x1f4] ss:$8 sps:$4 sm:$0xff]   ;;  %v458_v24 = vshll.u32 %v2519_v13, 16  ;;  %v803_v25 = vshrl.u32 %v2903_v5, 16 }
  0x28   : > { %1588 = vmatpush1.bf16.msra.mxu0 %v2459_v27  ;;  %1396 = vmatprep.subr.bf16.mxu1 %v2460_v28  ;;  %v2507_v19 = vld [vmem:[%s3417_s1 + $0x1e0] ss:$8 sps:$4 sm:$0xff]   ;;  %v2938_v26 = vld [vmem:[%s2858_s10 + $0x18] sm:$0xff]   ;;  %v807_v28 = vrot.slane %v805_v17, 1  ;;  %s2128_s30 = sshll.u32 %s188_s29, 9  ;;  %s2311_s6 = sshll.u32 %s2691_s19, 13 }
  0x29   : > { %1589 = vmatprep.subr.bf16.mxu0 %v2462_v29  ;;  %1414 = vmatprep.mubr.bf16.mxu1 %v449_v12  ;;  %v2941_v27 = vld [vmem:[%s2858_s10 + $0x24] sm:$0xff]   ;;  %v810_v29 = vshll.u32 %v2521_v16, 16  ;;  %v2527_v51 = vld [vmem:[%s2858_s10 + $0x2c] ss:$0 sps:$4 sm:$0x11]   ;;  %v2977_v4 = vld [vmem:[%s2858_s10 + $0x3c] sm:$0xff]   ;;  %s3366_s11 = scalar_lea.hbm %s3420_s4, %s2311_s6 }
  0x2a   : > { %1607 = vmatprep.mubr.bf16.mxu0 %v801_v14  ;;  %v2529_v53 = vld [vmem:[%s2858_s10 + $0x38] ss:$0 sps:$4 sm:$0x11]   ;;  %v482_v62 = vshll.u32 %v2527_v51, 16  ;;  %v841_v13 = vshll.u32 %v2977_v4, 16  ;;  %v2986_v15 = vld [vmem:[%s2858_s10 + $0x3c] sm:$0xff]  }
  0x2b   : > { %1397 = vmatpush1.bf16.msra.mxu1 %v2464_v30  ;;  %v2512_v30 = vld [vmem:[%s3417_s1 + $0xf0] ss:$8 sps:$4 sm:$0xff]   ;;  %v834_v63 = vshll.u32 %v2529_v53, 16  ;;  %s3178_s5 = scalar_lea.vmem [#allocation2], %s2128_s30  ;;  %s3375_s19 = scalar_lea.sflag [#allocation3], %s188_s29 }
  0x2c   : > { %1590 = vmatpush1.bf16.msra.mxu0 %v2465_v31  ;;  %1398 = vmatprep.subr.bf16.mxu1 %v2466_v32  ;;  %v2513_v31 = vld [vmem:[%s3417_s1 + $0x1f0] ss:$8 sps:$4 sm:$0xff]   ;;  %v2523_v32 = vld [vmem:[%s2858_s10 + $0x20] ss:$0 sps:$4 sm:$0x11]   ;;  %v484_v8 = vrot.slane %v482_v62, 1 }
  0x2d   : > { %1591 = vmatprep.subr.bf16.mxu0 %v2468_v33  ;;  %v2525_v33 = vld [vmem:[%s2858_s10 + $0x2c] ss:$0 sps:$4 sm:$0x11]   ;;  %v836_v12 = vrot.slane %v834_v63, 1  ;;  %s2062_s8 = sshll.u32 %s3178_s5, 4  ;;  %s2642_s13 = smov [#allocation2]   ;;  %s3368_s8 = int_to_ptr.vmem [resolvable:$true] %s2062_s8 }
  0x2e   : > { %s2578_s12 = scalar_lea.vmem %s3368_s8, 8192  ;;  %s2582_s14 = sshll.u32 %s2642_s13, 4  ;;  %s2583_s14 = int_to_ptr.vmem [resolvable:$false] %s2582_s14 }
  0x2f   : > { %1399 = vmatpush1.bf16.msra.mxu1 %v2470_v34  ;;  %v456_v34 = vor.u32 %v455_v23, %v451_v22  ;;  %v501_v23 = vshll.u32 %v2986_v15, 16  ;;  %p2579_p11 = scmp.ne.s32.totalorder %s3368_s8, %s2578_s12  ;;  %s2584_s20 = scalar_lea.vmem %s2583_s14, 16384 }
  0x30   : > { %1592 = vmatpush1.bf16.msra.mxu0 %v2471_v35  ;;  %1400 = vmatprep.subr.bf16.mxu1 %v2472_v36  ;;  %v465_v35 = vshll.u32 %v2938_v26, 16  ;;  %v460_v36 = vrot.slane %v458_v24, 1  ;;  %p2585_p0 = scmp.lt.s32.totalorder %s3368_s8, %s2583_s14  ;;  %p2586_p1 = scmp.lt.s32.totalorder %s2584_s20, %s2578_s12 }
  0x31   : > { %1593 = vmatprep.subr.bf16.mxu0 %v2474_v37  ;;  %v808_v37 = vor.u32 %v807_v28, %v803_v25  ;;  %v2535_v25 = vld [vmem:[%s2858_s10 + $0x44] ss:$0 sps:$4 sm:$0x11]   ;;  %v2537_v28 = vld [vmem:[%s2858_s10 + $0x50] ss:$0 sps:$4 sm:$0x11]   ;;  %p2580_p12 = pnand %p2579_p11, %p2708_p5 }
  0x32   : > { %p2587_p2 = por %p2586_p1, %p2585_p0 }
  0x33   : > { %1401 = vmatpush1.bf16.msra.mxu1 %v2476_v38  ;;  %v812_v38 = vrot.slane %v810_v29, 1  ;;  %p2581_p13 = pneg %p2580_p12 }
  0x34   : > { %1594 = vmatpush1.bf16.msra.mxu0 %v2477_v39  ;;  %1402 = vmatprep.subr.bf16.mxu1 %v2478_v40  ;;  %v817_v39 = vshll.u32 %v2941_v27, 16  ;;  %v463_v40 = vshrl.u32 %v2938_v26, 16 }
  0x35   : > { %1595 = vmatprep.subr.bf16.mxu0 %v2480_v41  ;;  %v2955_v41 = vld [vmem:[%s2858_s10 + $0x24] sm:$0xff]   ;;  %p2588_p3 = pnand %p2587_p2, %p2581_p13 }
  0x36   : > { %v477_v54 = vshll.u32 %v2955_v41, 16  ;;  %v475_v60 = vshrl.u32 %v2955_v41, 16 }
  0x37   : > { %1403 = vmatpush1.bf16.msra.mxu1 %v2482_v42  ;;  %v467_v42 = vrot.slane %v465_v35, 1 }
  0x38   : > { %1596 = vmatpush1.bf16.msra.mxu0 %v2483_v43  ;;  %1404 = vmatprep.subr.bf16.mxu1 %v2484_v44  ;;  %v470_v43 = vshll.u32 %v2523_v32, 16  ;;  %v815_v44 = vshrl.u32 %v2941_v27, 16  ;;  %v479_v61 = vrot.slane %v477_v54, 1  ;;  %v503_v32 = vrot.slane %v501_v23, 1 }
  0x39   : > { %1597 = vmatprep.subr.bf16.mxu0 %v2486_v45  ;;  %v822_v45 = vshll.u32 %v2525_v33, 16  ;;  %v506_v33 = vshll.u32 %v2535_v25, 16 }
  0x3b   : > { %1405 = vmatpush1.bf16.msra.mxu1 %v2488_v46  ;;  %v461_v46 = vsel %vm437_vm0, %v456_v34, %v460_v36  ;;  %v824_v58 = vrot.slane %v822_v45, 1  ;;  %v3004_v34 = vld [vmem:[%s2858_s10 + $0x48] sm:$0xff]  }
  0x3c   : > { %1598 = vmatpush1.bf16.msra.mxu0 %v2489_v47  ;;  %1406 = vmatprep.subr.bf16.mxu1 %v2490_v48  ;;  %v813_v47 = vsel %vm437_vm0, %v808_v37, %v812_v38  ;;  %v819_v48 = vrot.slane %v817_v39, 1  ;;  %v858_v38 = vshll.u32 %v2537_v28, 16  ;;  %v3009_v39 = vld [vmem:[%s2858_s10 + $0x54] sm:$0xff]  }
  0x3d   : > { %1599 = vmatprep.subr.bf16.mxu0 %v2492_v49  ;;  %v2961_v49 = vld [vmem:[%s2858_s10 + $0x30] sm:$0xff]   ;;  %v863_v53 = vshrl.u32 %v3009_v39, 16 }
  0x3e   : > { %v820_v57 = vor.u32 %v819_v48, %v815_v44  ;;  %v829_v59 = vshll.u32 %v2961_v49, 16  ;;  %v513_v44 = vshll.u32 %v3004_v34, 16  ;;  %v865_v48 = vshll.u32 %v3009_v39, 16 }
  0x3f   : > { %1407 = vmatpush1.bf16.msra.mxu1 %v2494_v55  ;;  %v468_v55 = vor.u32 %v467_v42, %v463_v40  ;;  %v2539_v40 = vld [vmem:[%s2858_s10 + $0x50] ss:$0 sps:$4 sm:$0x11]   ;;  %v2541_v42 = vld [vmem:[%s2858_s10 + $0x5c] ss:$0 sps:$4 sm:$0x11]  }
  0x40   : > { %1600 = vmatpush1.bf16.msra.mxu0 %v2495_v56  ;;  %1408 = vmatprep.subr.bf16.mxu1 %v2496_v2  ;;  %v472_v56 = vrot.slane %v470_v43, 1  ;;  %v825_v2 = vsel %vm437_vm0, %v820_v57, %v824_v58  ;;  %v508_v43 = vrot.slane %v506_v33, 1  ;;  %v515_v51 = vrot.slane %v513_v44, 1  ;;  %v2551_v33 = vld [vmem:[%s2858_s10 + $0x74] ss:$0 sps:$4 sm:$0x11]  }
  0x41   : > { %1601 = vmatprep.subr.bf16.mxu0 %v2498_v3  ;;  %v831_v3 = vrot.slane %v829_v59, 1  ;;  %v870_v54 = vshll.u32 %v2541_v42, 16  ;;  %v867_v58 = vrot.slane %v865_v48, 1  ;;  %v3025_v59 = vld [vmem:[%s2858_s10 + $0x60] sm:$0xff]  }
  0x42   : > { %v473_v0 = vsel %vm437_vm0, %v468_v55, %v472_v56  ;;  %v3020_v55 = vld [vmem:[%s2858_s10 + $0x54] sm:$0xff]   ;;  %v3073_v48 = vld [vmem:[%s2858_s10 + $0x84] sm:$0xff]  }
  0x43   : > { %1409 = vmatpush1.bf16.msra.mxu1 %v2500_v6  ;;  %v2531_v6 = vld [vmem:[%s2858_s10 + $0x38] ss:$0 sps:$4 sm:$0x11]  }
  0x44   : > { %1602 = vmatpush1.bf16.msra.mxu0 %v2501_v7  ;;  %1410 = vmatprep.subr.bf16.mxu1 %v2502_v10  ;;  %v480_v7 = vor.u32 %v479_v61, %v475_v60  ;;  %v2533_v10 = vld [vmem:[%s2858_s10 + $0x44] ss:$0 sps:$4 sm:$0x11]   ;;  %v494_v14 = vshll.u32 %v2531_v6, 16  ;;  %v523_v6 = vshrl.u32 %v3020_v55, 16 }
  0x45   : > { %1603 = vmatprep.subr.bf16.mxu0 %v2504_v11  ;;  %v2543_v60 = vld [vmem:[%s2858_s10 + $0x5c] ss:$0 sps:$4 sm:$0x11]   ;;  %v2545_v61 = vld [vmem:[%s2858_s10 + $0x68] ss:$0 sps:$4 sm:$0x11]  }
  0x46   : > { %v496_v22 = vrot.slane %v494_v14, 1  ;;  %v2547_v14 = vld [vmem:[%s2858_s10 + $0x68] ss:$0 sps:$4 sm:$0x11]  }
  0x47   : > { %1411 = vmatpush1.bf16.msra.mxu1 %v2506_v18  ;;  %v839_v18 = vshrl.u32 %v2977_v4, 16 }
  0x48   : > { %1604 = vmatpush1.bf16.msra.mxu0 %v2507_v19  ;;  %1412 = vmatprep.subr.bf16.mxu1 %v2508_v20  ;;  %v843_v19 = vrot.slane %v841_v13, 1  ;;  %v846_v20 = vshll.u32 %v2533_v10, 16  ;;  %v3041_v13 = vld [vmem:[%s2858_s10 + $0x6c] sm:$0xff]  }
  0x49   : > { %1605 = vmatprep.subr.bf16.mxu0 %v2510_v21  ;;  %v2993_v21 = vld [vmem:[%s2858_s10 + $0x48] sm:$0xff]  }
  0x4a   : > { %v844_v29 = vor.u32 %v843_v19, %v839_v18  ;;  %v851_v36 = vshrl.u32 %v2993_v21, 16 }
  0x4b   : > { %1413 = vmatpush1.bf16.msra.mxu1 %v2512_v30  ;;  %v848_v30 = vrot.slane %v846_v20, 1  ;;  %v889_v20 = vshll.u32 %v3041_v13, 16 }
  0x4c   : > { %1606 = vmatpush1.bf16.msra.mxu0 %v2513_v31  ;;  %v853_v31 = vshll.u32 %v2993_v21, 16 }
  0x4d   : > { %v849_v35 = vsel %vm437_vm0, %v844_v29, %v848_v30  ;;  %v891_v30 = vrot.slane %v889_v20, 1  ;;  %v3105_v20 = vld [vmem:[%s2858_s10 + $0x9c] sm:$0xff]  }
  0x4e   : > { %1415 = vmatmul.mubr.bf16.vlgmr.msra.gmra.mrb[0].mxu1 %v2876_v50  ;;  %v2971_v50 = vld [vmem:[%s2858_s10 + $0x30] sm:$0xff]   ;;  %v855_v37 = vrot.slane %v853_v31, 1  ;;  %v3057_v31 = vld [vmem:[%s2858_s10 + $0x78] sm:$0xff]  }
  0x4f   : > { %1608 = vmatmul.mubr.bf16.vlgmr.msra.gmra.mrb[0].mxu0 %v2880_v52  ;;  %1424 = vmatprep.mubr.bf16.mxu1 %v461_v46  ;;  %v827_v52 = vshrl.u32 %v2961_v49, 16  ;;  %v489_v9 = vshll.u32 %v2971_v50, 16 }
  0x50   : > { %1617 = vmatprep.mubr.bf16.mxu0 %v813_v47  ;;  %v856_v46 = vor.u32 %v855_v37, %v851_v36  ;;  %v860_v47 = vrot.slane %v858_v38, 1  ;;  %v901_v38 = vshll.u32 %v3057_v31, 16 }
  0x51   : > { %v832_v11 = vor.u32 %v831_v3, %v827_v52  ;;  %v491_v16 = vrot.slane %v489_v9, 1  ;;  %v525_v52 = vshll.u32 %v3020_v55, 16  ;;  %v877_v3 = vshll.u32 %v3025_v59, 16 }
  0x52   : > { %v861_v57 = vsel %vm437_vm0, %v856_v46, %v860_v47  ;;  %v882_v9 = vshll.u32 %v2545_v61, 16  ;;  %v903_v46 = vrot.slane %v901_v38, 1  ;;  %v3121_v38 = vld [vmem:[%s2858_s10 + $0xa8] sm:$0xff]  }
  0x53   : > { %v837_v17 = vsel %vm437_vm0, %v832_v11, %v836_v12  ;;  %v879_v12 = vrot.slane %v877_v3, 1  ;;  %v3089_v3 = vld [vmem:[%s2858_s10 + $0x90] sm:$0xff]  }
  0x54   : > { %v884_v19 = vrot.slane %v882_v9, 1 }
  0x56   : > { %1425 = vmatmul.mubr.bf16.gmra.mrb[4].mxu1 %v2894_v1  ;;  %v485_v1 = vsel %vm437_vm0, %v480_v7, %v484_v8  ;;  %v530_v7 = vshll.u32 %v2543_v60, 16  ;;  %v875_v8 = vshrl.u32 %v3025_v59, 16 }
  0x57   : > { %1618 = vmatmul.mubr.bf16.gmra.mrb[4].mxu0 %v2903_v5  ;;  %1434 = vmatprep.mubr.bf16.mxu1 %v473_v0  ;;  %v487_v5 = vshrl.u32 %v2971_v50, 16  ;;  %v868_v0 = vor.u32 %v867_v58, %v863_v53  ;;  %v913_v58 = vshll.u32 %v3073_v48, 16 }
  0x58   : > { %1627 = vmatprep.mubr.bf16.mxu0 %v825_v2  ;;  %v872_v2 = vrot.slane %v870_v54, 1  ;;  %v880_v18 = vor.u32 %v879_v12, %v875_v8  ;;  %v925_v12 = vshll.u32 %v3089_v3, 16 }
  0x59   : > { %v492_v24 = vor.u32 %v491_v16, %v487_v5 }
  0x5a   : > { %v873_v11 = vsel %vm437_vm0, %v868_v0, %v872_v2  ;;  %v885_v29 = vsel %vm437_vm0, %v880_v18, %v884_v19  ;;  %v915_v0 = vrot.slane %v913_v58, 1  ;;  %v927_v18 = vrot.slane %v925_v12, 1  ;;  %v2572_v58 = vld [vmem:[%s2858_s10 + $0xb4] sm:$0xff]   ;;  %v2576_v12 = vld [vmem:[%s2858_s10 + $0xc0] sm:$0xff]  }
  0x5e   : > { %1435 = vmatmul.mubr.bf16.gmra.mrb[8].mxu1 %v2938_v26  ;;  %v499_v26 = vshrl.u32 %v2986_v15, 16 }
  0x5f   : > { %1628 = vmatmul.mubr.bf16.gmra.mrb[8].mxu0 %v2941_v27  ;;  %1444 = vmatprep.mubr.bf16.mxu1 %v485_v1  ;;  %v497_v27 = vsel %vm437_vm0, %v492_v24, %v496_v22  ;;  %v2549_v1 = vld [vmem:[%s2858_s10 + $0x74] ss:$0 sps:$4 sm:$0x11]   ;;  %v542_v24 = vshll.u32 %v2547_v14, 16 }
  0x60   : > { %1637 = vmatprep.mubr.bf16.mxu0 %v837_v17  ;;  %v504_v45 = vor.u32 %v503_v32, %v499_v26  ;;  %v532_v17 = vrot.slane %v530_v7, 1  ;;  %v894_v25 = vshll.u32 %v2549_v1, 16  ;;  %v2559_v7 = vld [vmem:[%s2858_s10 + $0x8c] ss:$0 sps:$4 sm:$0x11]  }
  0x61   : > { %v544_v26 = vrot.slane %v542_v24, 1  ;;  %v2563_v24 = vld [vmem:[%s2858_s10 + $0x98] ss:$0 sps:$4 sm:$0x11]  }
  0x62   : > { %v509_v56 = vsel %vm437_vm0, %v504_v45, %v508_v43  ;;  %v896_v37 = vrot.slane %v894_v25, 1  ;;  %v3068_v43 = vld [vmem:[%s2858_s10 + $0x78] sm:$0xff]   ;;  %v899_v45 = vshrl.u32 %v3057_v31, 16 }
  0x63   : > { %v561_v53 = vshll.u32 %v3068_v43, 16 }
  0x64   : > { %v904_v54 = vor.u32 %v903_v46, %v899_v45  ;;  %v2569_v46 = vld [vmem:[%s2858_s10 + $0xb0] ss:$0 sps:$4 sm:$0x11]  }
  0x65   : > { %v563_v61 = vrot.slane %v561_v53, 1 }
  0x66   : > { %1445 = vmatmul.mubr.bf16.gmra.mrb[12].mxu1 %v2955_v41  ;;  %v511_v41 = vshrl.u32 %v3004_v34, 16 }
  0x67   : > { %1638 = vmatmul.mubr.bf16.gmra.mrb[12].mxu0 %v2961_v49  ;;  %1454 = vmatprep.mubr.bf16.mxu1 %v497_v27  ;;  %v518_v49 = vshll.u32 %v2539_v40, 16 }
  0x68   : > { %1647 = vmatprep.mubr.bf16.mxu0 %v849_v35  ;;  %v516_v62 = vor.u32 %v515_v51, %v511_v41  ;;  %v2553_v35 = vld [vmem:[%s2858_s10 + $0x80] ss:$0 sps:$4 sm:$0x11]  }
  0x69   : > { %v520_v63 = vrot.slane %v518_v49, 1  ;;  %v906_v47 = vshll.u32 %v2553_v35, 16  ;;  %v2555_v49 = vld [vmem:[%s2858_s10 + $0x80] ss:$0 sps:$4 sm:$0x11]   ;;  %v935_v35 = vshrl.u32 %v3105_v20, 16 }
  0x6b   : > { %v521_v10 = vsel %vm437_vm0, %v516_v62, %v520_v63  ;;  %v3084_v62 = vld [vmem:[%s2858_s10 + $0x84] sm:$0xff]   ;;  %v911_v63 = vshrl.u32 %v3073_v48, 16 }
  0x6c   : > { %v573_v8 = vshll.u32 %v3084_v62, 16 }
  0x6d   : > { %v916_v9 = vor.u32 %v915_v0, %v911_v63  ;;  %v2573_v0 = vld [vmem:[%s2858_s10 + $0xbc] ss:$0 sps:$4 sm:$0x11]  }
  0x6e   : > { %1455 = vmatmul.mubr.bf16.gmra.mrb[16].mxu1 %v2971_v50  ;;  %v3035_v50 = vld [vmem:[%s2858_s10 + $0x60] sm:$0xff]   ;;  %v575_v1 = vrot.slane %v573_v8, 1  ;;  %v2574_v8 = vld [vmem:[%s2858_s10 + $0xb4] sm:$0xff]  }
  0x6f   : > { %1648 = vmatmul.mubr.bf16.gmra.mrb[16].mxu0 %v2977_v4  ;;  %1464 = vmatprep.mubr.bf16.mxu1 %v509_v56  ;;  %v527_v4 = vrot.slane %v525_v52, 1  ;;  %v537_v5 = vshll.u32 %v3035_v50, 16  ;;  %v535_v22 = vshrl.u32 %v3035_v50, 16  ;;  %v908_v56 = vrot.slane %v906_v47, 1 }
  0x70   : > { %1657 = vmatprep.mubr.bf16.mxu0 %v861_v57  ;;  %v2557_v57 = vld [vmem:[%s2858_s10 + $0x8c] ss:$0 sps:$4 sm:$0x11]   ;;  %v949_v47 = vshll.u32 %v3121_v38, 16 }
  0x71   : > { %v528_v16 = vor.u32 %v527_v4, %v523_v6  ;;  %v539_v23 = vrot.slane %v537_v5, 1  ;;  %v909_v52 = vsel %vm437_vm0, %v904_v54, %v908_v56  ;;  %v918_v2 = vshll.u32 %v2557_v57, 16  ;;  %v3100_v5 = vld [vmem:[%s2858_s10 + $0x90] sm:$0xff]  }
  0x72   : > { %v947_v54 = vshrl.u32 %v3121_v38, 16  ;;  %v951_v56 = vrot.slane %v949_v47, 1  ;;  %v954_v57 = vshll.u32 %v2569_v46, 16 }
  0x73   : > { %v533_v28 = vsel %vm437_vm0, %v528_v16, %v532_v17  ;;  %v540_v27 = vor.u32 %v539_v23, %v535_v22  ;;  %v923_v17 = vshrl.u32 %v3089_v3, 16 }
  0x74   : > { %v956_v63 = vrot.slane %v954_v57, 1 }
  0x75   : > { %v545_v42 = vsel %vm437_vm0, %v540_v27, %v544_v26  ;;  %v928_v25 = vor.u32 %v927_v18, %v923_v17  ;;  %v3116_v27 = vld [vmem:[%s2858_s10 + $0x9c] sm:$0xff]   ;;  %v2577_v18 = vld [vmem:[%s2858_s10 + $0xc8] ss:$0 sps:$4 sm:$0x11]  }
  0x76   : > { %1465 = vmatmul.mubr.bf16.gmra.mrb[20].mxu1 %v2986_v15  ;;  %v3051_v15 = vld [vmem:[%s2858_s10 + $0x6c] sm:$0xff]  }
  0x77   : > { %1658 = vmatmul.mubr.bf16.gmra.mrb[20].mxu0 %v2993_v21  ;;  %1474 = vmatprep.mubr.bf16.mxu1 %v521_v10  ;;  %v887_v21 = vshrl.u32 %v3041_v13, 16  ;;  %v549_v32 = vshll.u32 %v3051_v15, 16  ;;  %v547_v40 = vshrl.u32 %v3051_v15, 16  ;;  %v920_v10 = vrot.slane %v918_v2, 1 }
  0x78   : > { %1667 = vmatprep.mubr.bf16.mxu0 %v873_v11  ;;  %v2561_v11 = vld [vmem:[%s2858_s10 + $0x98] ss:$0 sps:$4 sm:$0x11]   ;;  %v961_v2 = vshll.u32 %v2572_v58, 16 }
  0x79   : > { %v892_v36 = vor.u32 %v891_v30, %v887_v21  ;;  %v921_v16 = vsel %vm437_vm0, %v916_v9, %v920_v10  ;;  %v930_v19 = vshll.u32 %v2561_v11, 16  ;;  %v585_v21 = vshll.u32 %v3100_v5, 16 }
  0x7a   : > { %v937_v30 = vshll.u32 %v3105_v20, 16  ;;  %v959_v9 = vshrl.u32 %v2572_v58, 16  ;;  %v963_v10 = vrot.slane %v961_v2, 1  ;;  %v966_v11 = vshll.u32 %v2573_v0, 16 }
  0x7b   : > { %v897_v44 = vsel %vm437_vm0, %v892_v36, %v896_v37 }
  0x7c   : > { %v939_v36 = vrot.slane %v937_v30, 1  ;;  %v968_v17 = vrot.slane %v966_v11, 1 }
  0x7e   : > { %1475 = vmatmul.mubr.bf16.gmra.mrb[24].mxu1 %v3004_v34  ;;  %v551_v34 = vrot.slane %v549_v32, 1  ;;  %v587_v32 = vrot.slane %v585_v21, 1 }
  0x7f   : > { %1668 = vmatmul.mubr.bf16.gmra.mrb[24].mxu0 %v3009_v39  ;;  %1484 = vmatprep.mubr.bf16.mxu1 %v533_v28  ;;  %v554_v39 = vshll.u32 %v2551_v33, 16  ;;  %v932_v28 = vrot.slane %v930_v19, 1  ;;  %v973_v19 = vshll.u32 %v2576_v12, 16 }
  0x80   : > { %1677 = vmatprep.mubr.bf16.mxu0 %v885_v29  ;;  %v552_v41 = vor.u32 %v551_v34, %v547_v40  ;;  %v2565_v29 = vld [vmem:[%s2858_s10 + $0xa4] ss:$0 sps:$4 sm:$0x11]  }
  0x81   : > { %v556_v51 = vrot.slane %v554_v39, 1  ;;  %v933_v33 = vsel %vm437_vm0, %v928_v25, %v932_v28  ;;  %v942_v37 = vshll.u32 %v2565_v29, 16  ;;  %v597_v39 = vshll.u32 %v3116_v27, 16 }
  0x82   : > { %v975_v28 = vrot.slane %v973_v19, 1 }
  0x83   : > { %v557_v60 = vsel %vm437_vm0, %v552_v41, %v556_v51  ;;  %v944_v45 = vrot.slane %v942_v37, 1  ;;  %v599_v51 = vrot.slane %v597_v39, 1 }
  0x86   : > { %1485 = vmatmul.mubr.bf16.gmra.mrb[28].mxu1 %v3020_v55  ;;  %v559_v55 = vshrl.u32 %v3068_v43, 16 }
  0x87   : > { %1678 = vmatmul.mubr.bf16.gmra.mrb[28].mxu0 %v3025_v59  ;;  %1494 = vmatprep.mubr.bf16.mxu1 %v545_v42  ;;  %v566_v59 = vshll.u32 %v2555_v49, 16  ;;  %v2567_v42 = vld [vmem:[%s2858_s10 + $0xa4] ss:$0 sps:$4 sm:$0x11]   ;;  %v2570_v49 = vld [vmem:[%s2858_s10 + $0xa8] sm:$0xff]  }
  0x88   : > { %1687 = vmatprep.mubr.bf16.mxu0 %v897_v44  ;;  %v564_v6 = vor.u32 %v563_v61, %v559_v55  ;;  %v940_v44 = vor.u32 %v939_v36, %v935_v35  ;;  %v2571_v61 = vld [vmem:[%s2858_s10 + $0xb0] ss:$0 sps:$4 sm:$0x11]   ;;  %v1768_v36 = vld [vmem:[%s3418_s2] sm:$0x3] }
  0x89   : > { %v568_v4 = vrot.slane %v566_v59, 1  ;;  %v609_v59 = vshll.u32 %v2570_v49, 16 }
  0x8a   : > { %v945_v53 = vsel %vm437_vm0, %v940_v44, %v944_v45 }
  0x8b   : > { %v569_v14 = vsel %vm437_vm0, %v564_v6, %v568_v4  ;;  %v607_v4 = vshrl.u32 %v2570_v49, 16 }
  0x8e   : > { %1495 = vmatmul.mubr.bf16.gmra.mrb[32].mxu1 %v3035_v50  ;;  %v571_v50 = vshrl.u32 %v3084_v62, 16 }
  0x8f   : > { %1688 = vmatmul.mubr.bf16.gmra.mrb[32].mxu0 %v3041_v13  ;;  %1504 = vmatprep.mubr.bf16.mxu1 %v557_v60  ;;  %v578_v13 = vshll.u32 %v2559_v7, 16  ;;  %v611_v7 = vrot.slane %v609_v59, 1 }
  0x90   : > { %1697 = vmatprep.mubr.bf16.mxu0 %v909_v52  ;;  %v576_v22 = vor.u32 %v575_v1, %v571_v50  ;;  %v952_v52 = vor.u32 %v951_v56, %v947_v54  ;;  %v2575_v1 = vld [vmem:[%s2858_s10 + $0xbc] ss:$0 sps:$4 sm:$0x11]  }
  0x91   : > { %v580_v23 = vrot.slane %v578_v13, 1  ;;  %v621_v13 = vshll.u32 %v2574_v8, 16  ;;  %v626_v21 = vshll.u32 %v2575_v1, 16 }
  0x93   : > { %v581_v26 = vsel %vm437_vm0, %v576_v22, %v580_v23  ;;  %v619_v23 = vshrl.u32 %v2574_v8, 16  ;;  %v628_v30 = vrot.slane %v626_v21, 1 }
  0x96   : > { %1505 = vmatmul.mubr.bf16.gmra.mrb[36].mxu1 %v3051_v15  ;;  %v583_v15 = vshrl.u32 %v3100_v5, 16 }
  0x97   : > { %1698 = vmatmul.mubr.bf16.gmra.mrb[36].mxu0 %v3057_v31  ;;  %1514 = vmatprep.mubr.bf16.mxu1 %v569_v14  ;;  %v590_v31 = vshll.u32 %v2563_v24, 16  ;;  %v612_v14 = vor.u32 %v611_v7, %v607_v4  ;;  %v623_v24 = vrot.slane %v621_v13, 1 }
  0x98   : > { %1707 = vmatprep.mubr.bf16.mxu0 %v921_v16  ;;  %v588_v40 = vor.u32 %v587_v32, %v583_v15  ;;  %v964_v16 = vor.u32 %v963_v10, %v959_v9 }
  0x99   : > { %v592_v34 = vrot.slane %v590_v31, 1  ;;  %v624_v29 = vor.u32 %v623_v24, %v619_v23 }
  0x9a   : > { %v969_v25 = vsel %vm437_vm0, %v964_v16, %v968_v17 }
  0x9b   : > { %v593_v41 = vsel %vm437_vm0, %v588_v40, %v592_v34  ;;  %v629_v32 = vsel %vm437_vm0, %v624_v29, %v628_v30 }
  0x9e   : > { %1515 = vmatmul.mubr.bf16.gmra.mrb[40].mxu1 %v3068_v43  ;;  %v595_v43 = vshrl.u32 %v3116_v27, 16 }
  0x9f   : > { %1708 = vmatmul.mubr.bf16.gmra.mrb[40].mxu0 %v3073_v48  ;;  %1524 = vmatprep.mubr.bf16.mxu1 %v581_v26  ;;  %v602_v48 = vshll.u32 %v2567_v42, 16 }
  0xa0   : > { %1717 = vmatprep.mubr.bf16.mxu0 %v933_v33  ;;  %v600_v60 = vor.u32 %v599_v51, %v595_v43 }
  0xa1   : > { %v604_v55 = vrot.slane %v602_v48, 1 }
  0xa3   : > { %v605_v6 = vsel %vm437_vm0, %v600_v60, %v604_v55 }
  0xa6   : > { %1525 = vmatmul.mubr.bf16.gmra.mrb[44].mxu1 %v3084_v62  ;;  %v614_v62 = vshll.u32 %v2571_v61, 16 }
  0xa7   : > { %1718 = vmatmul.mubr.bf16.gmra.mrb[44].mxu0 %v3089_v3  ;;  %1534 = vmatprep.mubr.bf16.mxu1 %v593_v41  ;;  %v957_v3 = vsel %vm437_vm0, %v952_v52, %v956_v63 }
  0xa8   : > { %1727 = vmatprep.mubr.bf16.mxu0 %v945_v53  ;;  %v616_v50 = vrot.slane %v614_v62, 1 }
  0xaa   : > { %v617_v22 = vsel %vm437_vm0, %v612_v14, %v616_v50 }
  0xae   : > { %1535 = vmatmul.mubr.bf16.gmra.mrb[48].mxu1 %v3100_v5  ;;  %v971_v5 = vshrl.u32 %v2576_v12, 16 }
  0xaf   : > { %1728 = vmatmul.mubr.bf16.gmra.mrb[48].mxu0 %v3105_v20  ;;  %1544 = vmatprep.mubr.bf16.mxu1 %v605_v6  ;;  %v978_v20 = vshll.u32 %v2577_v18, 16 }
  0xb0   : > { %1737 = vmatprep.mubr.bf16.mxu0 %v957_v3  ;;  %v976_v26 = vor.u32 %v975_v28, %v971_v5 }
  0xb1   : > { %v980_v15 = vrot.slane %v978_v20, 1 }
  0xb3   : > { %v981_v31 = vsel %vm437_vm0, %v976_v26, %v980_v15 }
  0xb6   : > { %1545 = vmatmul.mubr.bf16.gmra.mrb[52].mxu1 %v3116_v27  ;;  %v1770_v27 = vlaneseq }
  0xb7   : > { %1738 = vmatmul.mubr.bf16.gmra.mrb[52].mxu0 %v3121_v38  ;;  %1554 = vmatprep.mubr.bf16.mxu1 %v617_v22  ;;  %v1844_v38 = vld [vmem:[%s3419_s3] sm:$0x3] }
  0xb8   : > { %1747 = vmatprep.mubr.bf16.mxu0 %v969_v25  ;;  %v1771_v33 = vshrl.u32 %v1770_v27, 7 }
  0xba   : > { %v1772_v35 = vsub.s32 0, %v1771_v33  ;;  %v1776_v37 = vsub.s32 1, %v1771_v33 }
  0xbc   : > { %v3159_v40 = vrot.slane %v1768_v36, %v1772_v35  ;;  %v3162_v39 = vrot.slane %v1768_v36, %v1776_v37  ;;  %v3164_v45 = vrot.slane %v1844_v38, %v1772_v35  ;;  %v3166_v43 = vrot.slane %v1844_v38, %v1776_v37 }
  0xbe   : > { %1555 = vmatmul.mubr.bf16.gmra.mrb[56].mxu1 %v2570_v49 }
  0xbf   : > { %1748 = vmatmul.mubr.bf16.gmra.mrb[56].mxu0 %v2572_v58  ;;  %1564 = vmatprep.mubr.bf16.mxu1 %v629_v32 }
  0xc0   : > { %1757 = vmatprep.mubr.bf16.mxu0 %v981_v31 }
  0xc6   : > { %1565 = vmatmul.mubr.bf16.gmra.mrb[60].mxu1 %v2574_v8 }
  0xc7   : > { %1758 = vmatmul.mubr.bf16.gmra.mrb[60].mxu0 %v2576_v12 }
 0x121   : > { %v1416_v34 = vpop.f32.mrb[0].mxu1 }
 0x122   : > { %v1609_v42 = vpop.f32.mrb[0].mxu0  ;;  %v1418_v46 = vpop.f32.mrb[1].mxu1 }
 0x123   : > { %v1610_v44 = vadd.f32 %v1609_v42, %v1416_v34  ;;  %v1611_v47 = vpop.f32.mrb[1].mxu0  ;;  %v1420_v51 = vpop.f32.mrb[2].mxu1 }
 0x124   : > { %v1612_v41 = vadd.f32 %v1611_v47, %v1418_v46  ;;  %v1613_v48 = vpop.f32.mrb[2].mxu0  ;;  %v1422_v54 = vpop.f32.mrb[3].mxu1 }
 0x125   : > { %v1780_v49 = vmul.f32 %v3159_v40, %v1610_v44  ;;  %v1614_v53 = vadd.f32 %v1613_v48, %v1420_v51  ;;  %v1615_v56 = vpop.f32.mrb[3].mxu0 }
 0x126   : > { %v1781_v57 = vmul.f32 %v3162_v39, %v1612_v41  ;;  %v1616_v58 = vadd.f32 %v1615_v56, %v1422_v54 }
 0x127   : > { %v1856_v60 = vadd.f32 %v3164_v45, %v1780_v49  ;;  %v1782_v55 = vmul.f32 %v3159_v40, %v1614_v53 }
 0x128   : > { %v1857_v61 = vadd.f32 %v3166_v43, %v1781_v57  ;;  %v1783_v59 = vmul.f32 %v3162_v39, %v1616_v58 }
 0x129   : > { %v1920_v52 = vmax.f32 %v1856_v60, 0.0  ;;  %v1858_v63 = vadd.f32 %v3164_v45, %v1782_v55  ;;  %v1426_v6 = vpop.f32.mrb[4].mxu1 }
 0x12a   : > { %v1921_v0 = vmax.f32 %v1857_v61, 0.0  ;;  %v1859_v2 = vadd.f32 %v3166_v43, %v1783_v59  ;;  %v1619_v4 = vpop.f32.mrb[4].mxu0  ;;  %v1428_v8 = vpop.f32.mrb[5].mxu1 }
 0x12b   : > { %1984 = vst [vmem:[%s3178_s5] sm:$0xff] %v1920_v52  ;;  %v1922_v7 = vmax.f32 %v1858_v63, 0.0  ;;  %v1620_v62 = vadd.f32 %v1619_v4, %v1426_v6  ;;  %v1621_v3 = vpop.f32.mrb[5].mxu0  ;;  %v1430_v11 = vpop.f32.mrb[6].mxu1 }
 0x12c   : > { %1985 = vst [vmem:[%s3178_s5 + $0x8] sm:$0xff] %v1921_v0  ;;  %v1923_v9 = vmax.f32 %v1859_v2, 0.0  ;;  %v1622_v10 = vadd.f32 %v1621_v3, %v1428_v8  ;;  %v1623_v12 = vpop.f32.mrb[6].mxu0  ;;  %v1432_v1 = vpop.f32.mrb[7].mxu1 }
 0x12d   : > { %1986 = vst [vmem:[%s3178_s5 + $0x10] sm:$0xff] %v1922_v7  ;;  %v1784_v14 = vmul.f32 %v3159_v40, %v1620_v62  ;;  %v1624_v50 = vadd.f32 %v1623_v12, %v1430_v11  ;;  %v1625_v13 = vpop.f32.mrb[7].mxu0 }
 0x12e   : > { %1987 = vst [vmem:[%s3178_s5 + $0x18] sm:$0xff] %v1923_v9  ;;  %v1785_v16 = vmul.f32 %v3162_v39, %v1622_v10  ;;  %v1626_v17 = vadd.f32 %v1625_v13, %v1432_v1 }
 0x12f   : > { %v1860_v18 = vadd.f32 %v3164_v45, %v1784_v14  ;;  %v1786_v19 = vmul.f32 %v3159_v40, %v1624_v50 }
 0x130   : > { %v1861_v22 = vadd.f32 %v3166_v43, %v1785_v16  ;;  %v1787_v23 = vmul.f32 %v3162_v39, %v1626_v17 }
 0x131   : > { %v1924_v24 = vmax.f32 %v1860_v18, 0.0  ;;  %v1862_v21 = vadd.f32 %v3164_v45, %v1786_v19  ;;  %v1436_v28 = vpop.f32.mrb[8].mxu1 }
 0x132   : > { %v1925_v25 = vmax.f32 %v1861_v22, 0.0  ;;  %v1863_v5 = vadd.f32 %v3166_v43, %v1787_v23  ;;  %v1629_v20 = vpop.f32.mrb[8].mxu0  ;;  %v1438_v26 = vpop.f32.mrb[9].mxu1 }
 0x133   : > { %1988 = vst [vmem:[%s3178_s5 + $0x20] sm:$0xff] %v1924_v24  ;;  %v1926_v29 = vmax.f32 %v1862_v21, 0.0  ;;  %v1630_v30 = vadd.f32 %v1629_v20, %v1436_v28  ;;  %v1631_v15 = vpop.f32.mrb[9].mxu0  ;;  %v1440_v27 = vpop.f32.mrb[10].mxu1 }
 0x134   : > { %1989 = vst [vmem:[%s3178_s5 + $0x28] sm:$0xff] %v1925_v25  ;;  %v1927_v32 = vmax.f32 %v1863_v5, 0.0  ;;  %v1632_v31 = vadd.f32 %v1631_v15, %v1438_v26  ;;  %v1633_v33 = vpop.f32.mrb[10].mxu0  ;;  %v1442_v37 = vpop.f32.mrb[11].mxu1 }
 0x135   : > { %1990 = vst [vmem:[%s3178_s5 + $0x30] sm:$0xff] %v1926_v29  ;;  %v1788_v35 = vmul.f32 %v3159_v40, %v1630_v30  ;;  %v1634_v36 = vadd.f32 %v1633_v33, %v1440_v27  ;;  %v1635_v38 = vpop.f32.mrb[11].mxu0 }
 0x136   : > { %1991 = vst [vmem:[%s3178_s5 + $0x38] sm:$0xff] %v1927_v32  ;;  %v1789_v34 = vmul.f32 %v3162_v39, %v1632_v31  ;;  %v1636_v42 = vadd.f32 %v1635_v38, %v1442_v37 }
 0x137   : > { %v1864_v44 = vadd.f32 %v3164_v45, %v1788_v35  ;;  %v1790_v46 = vmul.f32 %v3159_v40, %v1634_v36 }
 0x138   : > { %v1865_v47 = vadd.f32 %v3166_v43, %v1789_v34  ;;  %v1791_v41 = vmul.f32 %v3162_v39, %v1636_v42 }
 0x139   : > { %v1928_v51 = vmax.f32 %v1864_v44, 0.0  ;;  %v1866_v48 = vadd.f32 %v3164_v45, %v1790_v46  ;;  %v1446_v54 = vpop.f32.mrb[12].mxu1 }
 0x13a   : > { %v1929_v49 = vmax.f32 %v1865_v47, 0.0  ;;  %v1867_v53 = vadd.f32 %v3166_v43, %v1791_v41  ;;  %v1639_v56 = vpop.f32.mrb[12].mxu0  ;;  %v1448_v60 = vpop.f32.mrb[13].mxu1 }
 0x13b   : > { %1992 = vst [vmem:[%s3178_s5 + $0x40] sm:$0xff] %v1928_v51  ;;  %v1930_v57 = vmax.f32 %v1866_v48, 0.0  ;;  %v1640_v58 = vadd.f32 %v1639_v56, %v1446_v54  ;;  %v1641_v55 = vpop.f32.mrb[13].mxu0  ;;  %v1450_v52 = vpop.f32.mrb[14].mxu1 }
 0x13c   : > { %1993 = vst [vmem:[%s3178_s5 + $0x48] sm:$0xff] %v1929_v49  ;;  %v1931_v61 = vmax.f32 %v1867_v53, 0.0  ;;  %v1642_v59 = vadd.f32 %v1641_v55, %v1448_v60  ;;  %v1643_v63 = vpop.f32.mrb[14].mxu0  ;;  %v1452_v6 = vpop.f32.mrb[15].mxu1 }
 0x13d   : > { %1994 = vst [vmem:[%s3178_s5 + $0x50] sm:$0xff] %v1930_v57  ;;  %v1792_v0 = vmul.f32 %v3159_v40, %v1640_v58  ;;  %v1644_v2 = vadd.f32 %v1643_v63, %v1450_v52  ;;  %v1645_v4 = vpop.f32.mrb[15].mxu0 }
 0x13e   : > { %1995 = vst [vmem:[%s3178_s5 + $0x58] sm:$0xff] %v1931_v61  ;;  %v1793_v7 = vmul.f32 %v3162_v39, %v1642_v59  ;;  %v1646_v62 = vadd.f32 %v1645_v4, %v1452_v6 }
 0x13f   : > { %v1868_v8 = vadd.f32 %v3164_v45, %v1792_v0  ;;  %v1794_v3 = vmul.f32 %v3159_v40, %v1644_v2 }
 0x140   : > { %v1869_v9 = vadd.f32 %v3166_v43, %v1793_v7  ;;  %v1795_v10 = vmul.f32 %v3162_v39, %v1646_v62 }
 0x141   : > { %v1932_v11 = vmax.f32 %v1868_v8, 0.0  ;;  %v1870_v12 = vadd.f32 %v3164_v45, %v1794_v3  ;;  %v1456_v1 = vpop.f32.mrb[16].mxu1 }
 0x142   : > { %v1933_v14 = vmax.f32 %v1869_v9, 0.0  ;;  %v1871_v50 = vadd.f32 %v3166_v43, %v1795_v10  ;;  %v1649_v13 = vpop.f32.mrb[16].mxu0  ;;  %v1458_v18 = vpop.f32.mrb[17].mxu1 }
 0x143   : > { %1996 = vst [vmem:[%s3178_s5 + $0x60] sm:$0xff] %v1932_v11  ;;  %v1934_v16 = vmax.f32 %v1870_v12, 0.0  ;;  %v1650_v17 = vadd.f32 %v1649_v13, %v1456_v1  ;;  %v1651_v19 = vpop.f32.mrb[17].mxu0  ;;  %v1460_v24 = vpop.f32.mrb[18].mxu1 }
 0x144   : > { %1997 = vst [vmem:[%s3178_s5 + $0x68] sm:$0xff] %v1933_v14  ;;  %v1935_v22 = vmax.f32 %v1871_v50, 0.0  ;;  %v1652_v23 = vadd.f32 %v1651_v19, %v1458_v18  ;;  %v1653_v21 = vpop.f32.mrb[18].mxu0  ;;  %v1462_v28 = vpop.f32.mrb[19].mxu1 }
 0x145   : > { %1998 = vst [vmem:[%s3178_s5 + $0x70] sm:$0xff] %v1934_v16  ;;  %v1796_v25 = vmul.f32 %v3159_v40, %v1650_v17  ;;  %v1654_v5 = vadd.f32 %v1653_v21, %v1460_v24  ;;  %v1655_v20 = vpop.f32.mrb[19].mxu0 }
 0x146   : > { %1999 = vst [vmem:[%s3178_s5 + $0x78] sm:$0xff] %v1935_v22  ;;  %v1797_v29 = vmul.f32 %v3162_v39, %v1652_v23  ;;  %v1656_v30 = vadd.f32 %v1655_v20, %v1462_v28 }
 0x147   : > { %v1872_v26 = vadd.f32 %v3164_v45, %v1796_v25  ;;  %v1798_v15 = vmul.f32 %v3159_v40, %v1654_v5 }
 0x148   : > { %v1873_v32 = vadd.f32 %v3166_v43, %v1797_v29  ;;  %v1799_v31 = vmul.f32 %v3162_v39, %v1656_v30 }
 0x149   : > { %v1936_v27 = vmax.f32 %v1872_v26, 0.0  ;;  %v1874_v33 = vadd.f32 %v3164_v45, %v1798_v15  ;;  %v1466_v37 = vpop.f32.mrb[20].mxu1 }
 0x14a   : > { %v1937_v35 = vmax.f32 %v1873_v32, 0.0  ;;  %v1875_v36 = vadd.f32 %v3166_v43, %v1799_v31  ;;  %v1659_v38 = vpop.f32.mrb[20].mxu0  ;;  %v1468_v44 = vpop.f32.mrb[21].mxu1 }
 0x14b   : > { %2000 = vst [vmem:[%s3178_s5 + $0x80] sm:$0xff] %v1936_v27  ;;  %v1938_v34 = vmax.f32 %v1874_v33, 0.0  ;;  %v1660_v42 = vadd.f32 %v1659_v38, %v1466_v37  ;;  %v1661_v46 = vpop.f32.mrb[21].mxu0  ;;  %v1470_v51 = vpop.f32.mrb[22].mxu1 }
 0x14c   : > { %2001 = vst [vmem:[%s3178_s5 + $0x88] sm:$0xff] %v1937_v35  ;;  %v1939_v47 = vmax.f32 %v1875_v36, 0.0  ;;  %v1662_v41 = vadd.f32 %v1661_v46, %v1468_v44  ;;  %v1663_v48 = vpop.f32.mrb[22].mxu0  ;;  %v1472_v54 = vpop.f32.mrb[23].mxu1 }
 0x14d   : > { %2002 = vst [vmem:[%s3178_s5 + $0x90] sm:$0xff] %v1938_v34  ;;  %v1800_v49 = vmul.f32 %v3159_v40, %v1660_v42  ;;  %v1664_v53 = vadd.f32 %v1663_v48, %v1470_v51  ;;  %v1665_v56 = vpop.f32.mrb[23].mxu0 }
 0x14e   : > { %2003 = vst [vmem:[%s3178_s5 + $0x98] sm:$0xff] %v1939_v47  ;;  %v1801_v57 = vmul.f32 %v3162_v39, %v1662_v41  ;;  %v1666_v58 = vadd.f32 %v1665_v56, %v1472_v54 }
 0x14f   : > { %v1876_v60 = vadd.f32 %v3164_v45, %v1800_v49  ;;  %v1802_v55 = vmul.f32 %v3159_v40, %v1664_v53 }
 0x150   : > { %v1877_v61 = vadd.f32 %v3166_v43, %v1801_v57  ;;  %v1803_v59 = vmul.f32 %v3162_v39, %v1666_v58 }
 0x151   : > { %v1940_v52 = vmax.f32 %v1876_v60, 0.0  ;;  %v1878_v63 = vadd.f32 %v3164_v45, %v1802_v55  ;;  %v1476_v6 = vpop.f32.mrb[24].mxu1 }
 0x152   : > { %v1941_v0 = vmax.f32 %v1877_v61, 0.0  ;;  %v1879_v2 = vadd.f32 %v3166_v43, %v1803_v59  ;;  %v1669_v4 = vpop.f32.mrb[24].mxu0  ;;  %v1478_v8 = vpop.f32.mrb[25].mxu1 }
 0x153   : > { %2004 = vst [vmem:[%s3178_s5 + $0xa0] sm:$0xff] %v1940_v52  ;;  %v1942_v7 = vmax.f32 %v1878_v63, 0.0  ;;  %v1670_v62 = vadd.f32 %v1669_v4, %v1476_v6  ;;  %v1671_v3 = vpop.f32.mrb[25].mxu0  ;;  %v1480_v11 = vpop.f32.mrb[26].mxu1 }
 0x154   : > { %2005 = vst [vmem:[%s3178_s5 + $0xa8] sm:$0xff] %v1941_v0  ;;  %v1943_v9 = vmax.f32 %v1879_v2, 0.0  ;;  %v1672_v10 = vadd.f32 %v1671_v3, %v1478_v8  ;;  %v1673_v12 = vpop.f32.mrb[26].mxu0  ;;  %v1482_v1 = vpop.f32.mrb[27].mxu1 }
 0x155   : > { %2006 = vst [vmem:[%s3178_s5 + $0xb0] sm:$0xff] %v1942_v7  ;;  %v1804_v14 = vmul.f32 %v3159_v40, %v1670_v62  ;;  %v1674_v50 = vadd.f32 %v1673_v12, %v1480_v11  ;;  %v1675_v13 = vpop.f32.mrb[27].mxu0 }
 0x156   : > { %2007 = vst [vmem:[%s3178_s5 + $0xb8] sm:$0xff] %v1943_v9  ;;  %v1805_v16 = vmul.f32 %v3162_v39, %v1672_v10  ;;  %v1676_v17 = vadd.f32 %v1675_v13, %v1482_v1 }
 0x157   : > { %v1880_v18 = vadd.f32 %v3164_v45, %v1804_v14  ;;  %v1806_v19 = vmul.f32 %v3159_v40, %v1674_v50 }
 0x158   : > { %v1881_v22 = vadd.f32 %v3166_v43, %v1805_v16  ;;  %v1807_v23 = vmul.f32 %v3162_v39, %v1676_v17 }
 0x159   : > { %v1944_v24 = vmax.f32 %v1880_v18, 0.0  ;;  %v1882_v21 = vadd.f32 %v3164_v45, %v1806_v19  ;;  %v1486_v28 = vpop.f32.mrb[28].mxu1 }
 0x15a   : > { %v1945_v25 = vmax.f32 %v1881_v22, 0.0  ;;  %v1883_v5 = vadd.f32 %v3166_v43, %v1807_v23  ;;  %v1679_v20 = vpop.f32.mrb[28].mxu0  ;;  %v1488_v26 = vpop.f32.mrb[29].mxu1 }
 0x15b   : > { %2008 = vst [vmem:[%s3178_s5 + $0xc0] sm:$0xff] %v1944_v24  ;;  %v1946_v29 = vmax.f32 %v1882_v21, 0.0  ;;  %v1680_v30 = vadd.f32 %v1679_v20, %v1486_v28  ;;  %v1681_v15 = vpop.f32.mrb[29].mxu0  ;;  %v1490_v27 = vpop.f32.mrb[30].mxu1 }
 0x15c   : > { %2009 = vst [vmem:[%s3178_s5 + $0xc8] sm:$0xff] %v1945_v25  ;;  %v1947_v32 = vmax.f32 %v1883_v5, 0.0  ;;  %v1682_v31 = vadd.f32 %v1681_v15, %v1488_v26  ;;  %v1683_v33 = vpop.f32.mrb[30].mxu0  ;;  %v1492_v37 = vpop.f32.mrb[31].mxu1 }
 0x15d   : > { %2010 = vst [vmem:[%s3178_s5 + $0xd0] sm:$0xff] %v1946_v29  ;;  %v1808_v35 = vmul.f32 %v3159_v40, %v1680_v30  ;;  %v1684_v36 = vadd.f32 %v1683_v33, %v1490_v27  ;;  %v1685_v38 = vpop.f32.mrb[31].mxu0 }
 0x15e   : > { %2011 = vst [vmem:[%s3178_s5 + $0xd8] sm:$0xff] %v1947_v32  ;;  %v1809_v34 = vmul.f32 %v3162_v39, %v1682_v31  ;;  %v1686_v42 = vadd.f32 %v1685_v38, %v1492_v37 }
 0x15f   : > { %v1884_v44 = vadd.f32 %v3164_v45, %v1808_v35  ;;  %v1810_v46 = vmul.f32 %v3159_v40, %v1684_v36 }
 0x160   : > { %v1885_v47 = vadd.f32 %v3166_v43, %v1809_v34  ;;  %v1811_v41 = vmul.f32 %v3162_v39, %v1686_v42 }
 0x161   : > { %v1948_v51 = vmax.f32 %v1884_v44, 0.0  ;;  %v1886_v48 = vadd.f32 %v3164_v45, %v1810_v46  ;;  %v1496_v54 = vpop.f32.mrb[32].mxu1 }
 0x162   : > { %v1949_v49 = vmax.f32 %v1885_v47, 0.0  ;;  %v1887_v53 = vadd.f32 %v3166_v43, %v1811_v41  ;;  %v1689_v56 = vpop.f32.mrb[32].mxu0  ;;  %v1498_v60 = vpop.f32.mrb[33].mxu1 }
 0x163   : > { %2012 = vst [vmem:[%s3178_s5 + $0xe0] sm:$0xff] %v1948_v51  ;;  %v1950_v57 = vmax.f32 %v1886_v48, 0.0  ;;  %v1690_v58 = vadd.f32 %v1689_v56, %v1496_v54  ;;  %v1691_v55 = vpop.f32.mrb[33].mxu0  ;;  %v1500_v52 = vpop.f32.mrb[34].mxu1 }
 0x164   : > { %2013 = vst [vmem:[%s3178_s5 + $0xe8] sm:$0xff] %v1949_v49  ;;  %v1951_v61 = vmax.f32 %v1887_v53, 0.0  ;;  %v1692_v59 = vadd.f32 %v1691_v55, %v1498_v60  ;;  %v1693_v63 = vpop.f32.mrb[34].mxu0  ;;  %v1502_v6 = vpop.f32.mrb[35].mxu1 }
 0x165   : > { %2014 = vst [vmem:[%s3178_s5 + $0xf0] sm:$0xff] %v1950_v57  ;;  %v1812_v0 = vmul.f32 %v3159_v40, %v1690_v58  ;;  %v1694_v2 = vadd.f32 %v1693_v63, %v1500_v52  ;;  %v1695_v4 = vpop.f32.mrb[35].mxu0 }
 0x166   : > { %2015 = vst [vmem:[%s3178_s5 + $0xf8] sm:$0xff] %v1951_v61  ;;  %v1813_v7 = vmul.f32 %v3162_v39, %v1692_v59  ;;  %v1696_v62 = vadd.f32 %v1695_v4, %v1502_v6 }
 0x167   : > { %v1888_v8 = vadd.f32 %v3164_v45, %v1812_v0  ;;  %v1814_v3 = vmul.f32 %v3159_v40, %v1694_v2 }
 0x168   : > { %v1889_v9 = vadd.f32 %v3166_v43, %v1813_v7  ;;  %v1815_v10 = vmul.f32 %v3162_v39, %v1696_v62 }
 0x169   : > { %v1952_v11 = vmax.f32 %v1888_v8, 0.0  ;;  %v1890_v12 = vadd.f32 %v3164_v45, %v1814_v3  ;;  %v1506_v1 = vpop.f32.mrb[36].mxu1 }
 0x16a   : > { %v1953_v14 = vmax.f32 %v1889_v9, 0.0  ;;  %v1891_v50 = vadd.f32 %v3166_v43, %v1815_v10  ;;  %v1699_v13 = vpop.f32.mrb[36].mxu0  ;;  %v1508_v18 = vpop.f32.mrb[37].mxu1 }
 0x16b   : > { %2016 = vst [vmem:[%s3178_s5 + $0x100] sm:$0xff] %v1952_v11  ;;  %v1954_v16 = vmax.f32 %v1890_v12, 0.0  ;;  %v1700_v17 = vadd.f32 %v1699_v13, %v1506_v1  ;;  %v1701_v19 = vpop.f32.mrb[37].mxu0  ;;  %v1510_v24 = vpop.f32.mrb[38].mxu1 }
 0x16c   : > { %2017 = vst [vmem:[%s3178_s5 + $0x108] sm:$0xff] %v1953_v14  ;;  %v1955_v22 = vmax.f32 %v1891_v50, 0.0  ;;  %v1702_v23 = vadd.f32 %v1701_v19, %v1508_v18  ;;  %v1703_v21 = vpop.f32.mrb[38].mxu0  ;;  %v1512_v28 = vpop.f32.mrb[39].mxu1 }
 0x16d   : > { %2018 = vst [vmem:[%s3178_s5 + $0x110] sm:$0xff] %v1954_v16  ;;  %v1816_v25 = vmul.f32 %v3159_v40, %v1700_v17  ;;  %v1704_v5 = vadd.f32 %v1703_v21, %v1510_v24  ;;  %v1705_v20 = vpop.f32.mrb[39].mxu0 }
 0x16e   : > { %2019 = vst [vmem:[%s3178_s5 + $0x118] sm:$0xff] %v1955_v22  ;;  %v1817_v29 = vmul.f32 %v3162_v39, %v1702_v23  ;;  %v1706_v30 = vadd.f32 %v1705_v20, %v1512_v28 }
 0x16f   : > { %v1892_v26 = vadd.f32 %v3164_v45, %v1816_v25  ;;  %v1818_v15 = vmul.f32 %v3159_v40, %v1704_v5 }
 0x170   : > { %v1893_v32 = vadd.f32 %v3166_v43, %v1817_v29  ;;  %v1819_v31 = vmul.f32 %v3162_v39, %v1706_v30 }
 0x171   : > { %v1956_v27 = vmax.f32 %v1892_v26, 0.0  ;;  %v1894_v33 = vadd.f32 %v3164_v45, %v1818_v15  ;;  %v1516_v37 = vpop.f32.mrb[40].mxu1 }
 0x172   : > { %v1957_v35 = vmax.f32 %v1893_v32, 0.0  ;;  %v1895_v36 = vadd.f32 %v3166_v43, %v1819_v31  ;;  %v1709_v38 = vpop.f32.mrb[40].mxu0  ;;  %v1518_v44 = vpop.f32.mrb[41].mxu1 }
 0x173   : > { %2020 = vst [vmem:[%s3178_s5 + $0x120] sm:$0xff] %v1956_v27  ;;  %v1958_v34 = vmax.f32 %v1894_v33, 0.0  ;;  %v1710_v42 = vadd.f32 %v1709_v38, %v1516_v37  ;;  %v1711_v46 = vpop.f32.mrb[41].mxu0  ;;  %v1520_v51 = vpop.f32.mrb[42].mxu1 }
 0x174   : > { %2021 = vst [vmem:[%s3178_s5 + $0x128] sm:$0xff] %v1957_v35  ;;  %v1959_v47 = vmax.f32 %v1895_v36, 0.0  ;;  %v1712_v41 = vadd.f32 %v1711_v46, %v1518_v44  ;;  %v1713_v48 = vpop.f32.mrb[42].mxu0  ;;  %v1522_v54 = vpop.f32.mrb[43].mxu1 }
 0x175   : > { %2022 = vst [vmem:[%s3178_s5 + $0x130] sm:$0xff] %v1958_v34  ;;  %v1820_v49 = vmul.f32 %v3159_v40, %v1710_v42  ;;  %v1714_v53 = vadd.f32 %v1713_v48, %v1520_v51  ;;  %v1715_v56 = vpop.f32.mrb[43].mxu0 }
 0x176   : > { %2023 = vst [vmem:[%s3178_s5 + $0x138] sm:$0xff] %v1959_v47  ;;  %v1821_v57 = vmul.f32 %v3162_v39, %v1712_v41  ;;  %v1716_v58 = vadd.f32 %v1715_v56, %v1522_v54 }
 0x177   : > { %v1896_v60 = vadd.f32 %v3164_v45, %v1820_v49  ;;  %v1822_v55 = vmul.f32 %v3159_v40, %v1714_v53 }
 0x178   : > { %v1897_v61 = vadd.f32 %v3166_v43, %v1821_v57  ;;  %v1823_v59 = vmul.f32 %v3162_v39, %v1716_v58 }
 0x179   : > { %v1960_v52 = vmax.f32 %v1896_v60, 0.0  ;;  %v1898_v63 = vadd.f32 %v3164_v45, %v1822_v55  ;;  %v1526_v6 = vpop.f32.mrb[44].mxu1 }
 0x17a   : > { %v1961_v0 = vmax.f32 %v1897_v61, 0.0  ;;  %v1899_v2 = vadd.f32 %v3166_v43, %v1823_v59  ;;  %v1719_v4 = vpop.f32.mrb[44].mxu0  ;;  %v1528_v8 = vpop.f32.mrb[45].mxu1 }
 0x17b   : > { %2024 = vst [vmem:[%s3178_s5 + $0x140] sm:$0xff] %v1960_v52  ;;  %v1962_v7 = vmax.f32 %v1898_v63, 0.0  ;;  %v1720_v62 = vadd.f32 %v1719_v4, %v1526_v6  ;;  %v1721_v3 = vpop.f32.mrb[45].mxu0  ;;  %v1530_v11 = vpop.f32.mrb[46].mxu1 }
 0x17c   : > { %2025 = vst [vmem:[%s3178_s5 + $0x148] sm:$0xff] %v1961_v0  ;;  %v1963_v9 = vmax.f32 %v1899_v2, 0.0  ;;  %v1722_v10 = vadd.f32 %v1721_v3, %v1528_v8  ;;  %v1723_v12 = vpop.f32.mrb[46].mxu0  ;;  %v1532_v1 = vpop.f32.mrb[47].mxu1 }
 0x17d   : > { %2026 = vst [vmem:[%s3178_s5 + $0x150] sm:$0xff] %v1962_v7  ;;  %v1824_v14 = vmul.f32 %v3159_v40, %v1720_v62  ;;  %v1724_v50 = vadd.f32 %v1723_v12, %v1530_v11  ;;  %v1725_v13 = vpop.f32.mrb[47].mxu0 }
 0x17e   : > { %2027 = vst [vmem:[%s3178_s5 + $0x158] sm:$0xff] %v1963_v9  ;;  %v1825_v16 = vmul.f32 %v3162_v39, %v1722_v10  ;;  %v1726_v17 = vadd.f32 %v1725_v13, %v1532_v1 }
 0x17f   : > { %v1900_v18 = vadd.f32 %v3164_v45, %v1824_v14  ;;  %v1826_v19 = vmul.f32 %v3159_v40, %v1724_v50 }
 0x180   : > { %v1901_v22 = vadd.f32 %v3166_v43, %v1825_v16  ;;  %v1827_v23 = vmul.f32 %v3162_v39, %v1726_v17 }
 0x181   : > { %v1964_v24 = vmax.f32 %v1900_v18, 0.0  ;;  %v1902_v21 = vadd.f32 %v3164_v45, %v1826_v19  ;;  %v1536_v28 = vpop.f32.mrb[48].mxu1 }
 0x182   : > { %v1965_v25 = vmax.f32 %v1901_v22, 0.0  ;;  %v1903_v5 = vadd.f32 %v3166_v43, %v1827_v23  ;;  %v1729_v20 = vpop.f32.mrb[48].mxu0  ;;  %v1538_v26 = vpop.f32.mrb[49].mxu1 }
 0x183   : > { %2028 = vst [vmem:[%s3178_s5 + $0x160] sm:$0xff] %v1964_v24  ;;  %v1966_v29 = vmax.f32 %v1902_v21, 0.0  ;;  %v1730_v30 = vadd.f32 %v1729_v20, %v1536_v28  ;;  %v1731_v15 = vpop.f32.mrb[49].mxu0  ;;  %v1540_v27 = vpop.f32.mrb[50].mxu1 }
 0x184   : > { %2029 = vst [vmem:[%s3178_s5 + $0x168] sm:$0xff] %v1965_v25  ;;  %v1967_v32 = vmax.f32 %v1903_v5, 0.0  ;;  %v1732_v31 = vadd.f32 %v1731_v15, %v1538_v26  ;;  %v1733_v33 = vpop.f32.mrb[50].mxu0  ;;  %v1542_v37 = vpop.f32.mrb[51].mxu1 }
 0x185   : > { %2030 = vst [vmem:[%s3178_s5 + $0x170] sm:$0xff] %v1966_v29  ;;  %v1828_v35 = vmul.f32 %v3159_v40, %v1730_v30  ;;  %v1734_v36 = vadd.f32 %v1733_v33, %v1540_v27  ;;  %v1735_v38 = vpop.f32.mrb[51].mxu0 }
 0x186   : > { %2031 = vst [vmem:[%s3178_s5 + $0x178] sm:$0xff] %v1967_v32  ;;  %v1829_v34 = vmul.f32 %v3162_v39, %v1732_v31  ;;  %v1736_v42 = vadd.f32 %v1735_v38, %v1542_v37 }
 0x187   : > { %v1904_v44 = vadd.f32 %v3164_v45, %v1828_v35  ;;  %v1830_v46 = vmul.f32 %v3159_v40, %v1734_v36 }
 0x188   : > { %v1905_v47 = vadd.f32 %v3166_v43, %v1829_v34  ;;  %v1831_v41 = vmul.f32 %v3162_v39, %v1736_v42 }
 0x189   : > { %v1968_v51 = vmax.f32 %v1904_v44, 0.0  ;;  %v1906_v48 = vadd.f32 %v3164_v45, %v1830_v46  ;;  %v1546_v54 = vpop.f32.mrb[52].mxu1 }
 0x18a   : > { %v1969_v49 = vmax.f32 %v1905_v47, 0.0  ;;  %v1907_v53 = vadd.f32 %v3166_v43, %v1831_v41  ;;  %v1739_v56 = vpop.f32.mrb[52].mxu0  ;;  %v1548_v60 = vpop.f32.mrb[53].mxu1 }
 0x18b   : > { %2032 = vst [vmem:[%s3178_s5 + $0x180] sm:$0xff] %v1968_v51  ;;  %v1970_v57 = vmax.f32 %v1906_v48, 0.0  ;;  %v1740_v58 = vadd.f32 %v1739_v56, %v1546_v54  ;;  %v1741_v55 = vpop.f32.mrb[53].mxu0  ;;  %v1550_v52 = vpop.f32.mrb[54].mxu1 }
 0x18c   : > { %2033 = vst [vmem:[%s3178_s5 + $0x188] sm:$0xff] %v1969_v49  ;;  %v1971_v61 = vmax.f32 %v1907_v53, 0.0  ;;  %v1742_v59 = vadd.f32 %v1741_v55, %v1548_v60  ;;  %v1743_v63 = vpop.f32.mrb[54].mxu0  ;;  %v1552_v6 = vpop.f32.mrb[55].mxu1 }
 0x18d   : > { %2034 = vst [vmem:[%s3178_s5 + $0x190] sm:$0xff] %v1970_v57  ;;  %v1832_v0 = vmul.f32 %v3159_v40, %v1740_v58  ;;  %v1744_v2 = vadd.f32 %v1743_v63, %v1550_v52  ;;  %v1745_v4 = vpop.f32.mrb[55].mxu0 }
 0x18e   : > { %2035 = vst [vmem:[%s3178_s5 + $0x198] sm:$0xff] %v1971_v61  ;;  %v1833_v7 = vmul.f32 %v3162_v39, %v1742_v59  ;;  %v1746_v62 = vadd.f32 %v1745_v4, %v1552_v6 }
 0x18f   : > { %v1908_v8 = vadd.f32 %v3164_v45, %v1832_v0  ;;  %v1834_v3 = vmul.f32 %v3159_v40, %v1744_v2 }
 0x190   : > { %v1909_v9 = vadd.f32 %v3166_v43, %v1833_v7  ;;  %v1835_v10 = vmul.f32 %v3162_v39, %v1746_v62 }
 0x191   : > { %v1972_v11 = vmax.f32 %v1908_v8, 0.0  ;;  %v1910_v12 = vadd.f32 %v3164_v45, %v1834_v3  ;;  %v1556_v1 = vpop.f32.mrb[56].mxu1 }
 0x192   : > { %v1973_v14 = vmax.f32 %v1909_v9, 0.0  ;;  %v1911_v50 = vadd.f32 %v3166_v43, %v1835_v10  ;;  %v1749_v13 = vpop.f32.mrb[56].mxu0  ;;  %v1558_v18 = vpop.f32.mrb[57].mxu1 }
 0x193   : > { %2036 = vst [vmem:[%s3178_s5 + $0x1a0] sm:$0xff] %v1972_v11  ;;  %v1974_v16 = vmax.f32 %v1910_v12, 0.0  ;;  %v1750_v17 = vadd.f32 %v1749_v13, %v1556_v1  ;;  %v1751_v19 = vpop.f32.mrb[57].mxu0  ;;  %v1560_v24 = vpop.f32.mrb[58].mxu1 }
 0x194   : > { %2037 = vst [vmem:[%s3178_s5 + $0x1a8] sm:$0xff] %v1973_v14  ;;  %v1975_v22 = vmax.f32 %v1911_v50, 0.0  ;;  %v1752_v23 = vadd.f32 %v1751_v19, %v1558_v18  ;;  %v1753_v21 = vpop.f32.mrb[58].mxu0  ;;  %v1562_v28 = vpop.f32.mrb[59].mxu1 }
 0x195   : > { %2038 = vst [vmem:[%s3178_s5 + $0x1b0] sm:$0xff] %v1974_v16  ;;  %v1836_v25 = vmul.f32 %v3159_v40, %v1750_v17  ;;  %v1754_v5 = vadd.f32 %v1753_v21, %v1560_v24  ;;  %v1755_v20 = vpop.f32.mrb[59].mxu0 }
 0x196   : > { %2039 = vst [vmem:[%s3178_s5 + $0x1b8] sm:$0xff] %v1975_v22  ;;  %v1837_v29 = vmul.f32 %v3162_v39, %v1752_v23  ;;  %v1756_v30 = vadd.f32 %v1755_v20, %v1562_v28 }
 0x197   : > { %v1912_v26 = vadd.f32 %v3164_v45, %v1836_v25  ;;  %v1838_v15 = vmul.f32 %v3159_v40, %v1754_v5 }
 0x198   : > { %v1913_v32 = vadd.f32 %v3166_v43, %v1837_v29  ;;  %v1839_v31 = vmul.f32 %v3162_v39, %v1756_v30 }
 0x199   : > { %v1976_v27 = vmax.f32 %v1912_v26, 0.0  ;;  %v1914_v33 = vadd.f32 %v3164_v45, %v1838_v15  ;;  %v1566_v37 = vpop.f32.mrb[60].mxu1 }
 0x19a   : > { %v1977_v35 = vmax.f32 %v1913_v32, 0.0  ;;  %v1915_v36 = vadd.f32 %v3166_v43, %v1839_v31  ;;  %v1759_v38 = vpop.f32.mrb[60].mxu0  ;;  %v1568_v44 = vpop.f32.mrb[61].mxu1 }
 0x19b   : > { %2040 = vst [vmem:[%s3178_s5 + $0x1c0] sm:$0xff] %v1976_v27  ;;  %v1978_v34 = vmax.f32 %v1914_v33, 0.0  ;;  %v1760_v42 = vadd.f32 %v1759_v38, %v1566_v37  ;;  %v1761_v46 = vpop.f32.mrb[61].mxu0  ;;  %v1570_v51 = vpop.f32.mrb[62].mxu1 }
 0x19c   : > { %2041 = vst [vmem:[%s3178_s5 + $0x1c8] sm:$0xff] %v1977_v35  ;;  %v1979_v47 = vmax.f32 %v1915_v36, 0.0  ;;  %v1762_v41 = vadd.f32 %v1761_v46, %v1568_v44  ;;  %v1763_v48 = vpop.f32.mrb[62].mxu0  ;;  %v1572_v54 = vpop.f32.mrb[63].mxu1 }
 0x19d   : > { %2042 = vst [vmem:[%s3178_s5 + $0x1d0] sm:$0xff] %v1978_v34  ;;  %v1840_v49 = vmul.f32 %v3159_v40, %v1760_v42  ;;  %v1764_v53 = vadd.f32 %v1763_v48, %v1570_v51  ;;  %v1765_v56 = vpop.f32.mrb[63].mxu0 }
 0x19e   : > { %2043 = vst [vmem:[%s3178_s5 + $0x1d8] sm:$0xff] %v1979_v47  ;;  %v1841_v57 = vmul.f32 %v3162_v39, %v1762_v41  ;;  %v1766_v58 = vadd.f32 %v1765_v56, %v1572_v54 }
 0x19f   : > { %v1916_v60 = vadd.f32 %v3164_v45, %v1840_v49  ;;  %v1842_v55 = vmul.f32 %v3159_v40, %v1764_v53 }
 0x1a0   : > { %v1917_v61 = vadd.f32 %v3166_v43, %v1841_v57  ;;  %v1843_v59 = vmul.f32 %v3162_v39, %v1766_v58 }
 0x1a1   : > { %v1980_v52 = vmax.f32 %v1916_v60, 0.0  ;;  %v1918_v63 = vadd.f32 %v3164_v45, %v1842_v55 }
 0x1a2   : > { %v1981_v0 = vmax.f32 %v1917_v61, 0.0  ;;  %v1919_v2 = vadd.f32 %v3166_v43, %v1843_v59 }
 0x1a3   : > { %2044 = vst [vmem:[%s3178_s5 + $0x1e0] sm:$0xff] %v1980_v52  ;;  %v1982_v6 = vmax.f32 %v1918_v63, 0.0 }
 0x1a4   : > { %2045 = vst [vmem:[%s3178_s5 + $0x1e8] sm:$0xff] %v1981_v0  ;;  %v1983_v40 = vmax.f32 %v1919_v2, 0.0 }
 0x1a5   : > { %2046 = vst [vmem:[%s3178_s5 + $0x1f0] sm:$0xff] %v1982_v6 }
 0x1a6   : > { %2047 = vst [vmem:[%s3178_s5 + $0x1f8] sm:$0xff] %v1983_v40 }
 0x1a7   : > { %2591 = shalt.err (!%p2588_p3)
}
 0x1a8   : > { %s2592_s23 = scalar_lea.hbm %s3366_s11, 8192  ;;  %s2596_s27 = scalar_lea.hbm %s3420_s4, 16384 }
 0x1a9   : > { %p2593_p4 = scmp.ne.s32.totalorder %s3366_s11, %s2592_s23  ;;  %p2597_p9 = scmp.lt.u32.totalorder %s3366_s11, %s3420_s4 }
 0x1aa   : > { %p2598_p10 = scmp.lt.u32.totalorder %s2596_s27, %s2592_s23  ;;  %p2600_p12 = scmp.lt.u32.totalorder %s2592_s23, %s3366_s11 }
 0x1ab   : > { %p2594_p7 = pnand %p2593_p4, %p2708_p5 }
 0x1ac   : > { %p2599_p11 = por %p2598_p10, %p2597_p9 }
 0x1ad   : > { %p2595_p8 = pneg %p2594_p7 }
 0x1ae   : > { %p2601_p13 = por %p2600_p12, %p2599_p11 }
 0x1b0   : > { %p2602_p0 = pnand %p2601_p13, %p2595_p8 }
 0x1b2   : > { %2605 = shalt.err (!%p2602_p0)
}
 0x1b3   : > { %s2643_s30 = smov 256   ;;  %s2644_s5 = smov 16  }
 0x1b4   : > { %2377 = dma.vmem_to_hbm [thread:$0]  (%p2708_p5), %s3368_s8, 8192, %s3366_s11, %s3375_s19, %s2643_s30, %s2643_s30, %s2644_s5  }
 0x1b5 PF: > { %p2383_p1 = scmp.ge.s32.totalorder %s2640_s18, 2  ;;  %s2077_s6 = sand.u32 1, %s2628_s15  }
 0x1b6   : > { %s2078_s7 = scalar_lea.sflag [#allocation3], %s2077_s6 }
 0x1b7   : > { %p2380_p2 = pnand %p2383_p1, %p2712_p6 }
 0x1b9   : > { %2623 = dma.done.wait (!%p2380_p2), %s2078_s7, 8192  }
 0x1ba   : > { %2625 = vsyncadd (!%p2380_p2), %s2078_s7, 4294959104  ;;  %p14_p3 = scmp.ge.s32.totalorder %s2695_s21, 4   ;;  %s3423_s15 = smov %s2632_s16 }
 0x1bb   : > { %s3424_s16 = smov %s2636_s17  ;;  %s3425_s17 = smov %s2706_s24 }
 0x1bc   : > { %s3426_s18 = smov %s2695_s21  ;;  %16 = sbr.rel (!%p14_p3) target bundleno = 3 (0x3), region = 72 }
 0x1c3   :  { %2083 = vsyncpa [#allocation3], 1 }
 0x1c4   :  { %2085 = vsyncpa [#allocation3 + $0x1], 1 }

</bundles_post_ra>
